<compile_context>
chip_gen: v7x
topology: tpu7x:2x2x1
jax: 0.10.0
libtpu: 0.0.40
codegen_flags: <defaults>
</compile_context>

<pallas_src>
import functools
import math

import jax
import jax.numpy as jnp
from jax.experimental import pallas as pl
from jax.experimental.pallas import tpu as pltpu

VOCAB = 30522
LN_EPS = 1e-5  # PyTorch TransformerEncoderLayer default layer_norm_eps


def _layer_norm(x, w, b):
    mu = jnp.mean(x, axis=-1, keepdims=True)
    var = jnp.mean((x - mu) ** 2, axis=-1, keepdims=True)
    return (x - mu) * jax.lax.rsqrt(var + LN_EPS) * w + b


def fused_encoder_kernel(mask_ref, x_ref,
                         w_qkv_ref, b_qkv_ref, w_out_ref, b_out_ref,
                         ln1_w_ref, ln1_b_ref, ln2_w_ref, ln2_b_ref,
                         w_ff1_ref, b_ff1_ref, w_ff2_ref, b_ff2_ref,
                         qa_w_ref, qa_b_ref,
                         start_ref, end_ref,
                         x_acc, ctx_acc, *, num_heads):
    """Grid = (batch_block, layer).  One Bt-row batch block per 'parallel'
    step; the layer axis is 'arbitrary' with the flattened (Bt*S, D)
    activation held in the VMEM scratch `x_acc`."""
    l = pl.program_id(1)
    num_layers = pl.num_programs(1)

    Bt = mask_ref.shape[0]
    S = mask_ref.shape[2]
    D = w_out_ref.shape[0]
    H = num_heads
    hd = D // H
    f32 = jnp.float32
    bf16 = jnp.bfloat16

    # Load the embedding block into the resident accumulator once per batch block.
    @pl.when(l == 0)
    def _():
        x_acc[...] = x_ref[...]

    x = x_acc[...]                                  # (Bt*S, D) f32
    x16 = x.astype(bf16)
    add_mask = mask_ref[...]                        # (Bt, 1, S): 0.0 valid / -1e9 pad

    # ---------------- fused QKV projection (full MXU width) ----------------
    # (Bt*S, D) x (D, 3D); 1/sqrt(hd) already folded into the q columns.
    qkv = jnp.dot(x16, w_qkv_ref[...], preferred_element_type=f32) + b_qkv_ref[...]

    # ---------------- per-row attention: scores / softmax / P.V -------------
    # Heads are split only here (lane slices stacked to (H, S, hd)); the
    # per-head hd-shaped matmuls are the unavoidable q.k^T and p.v.
    # TODO(synk): for long sequences (S >= ~1024) add flash-style key tiling
    # so the (H, S, S) score tensor stays bounded in VMEM.
    for b in range(Bt):
        rows = slice(b * S, (b + 1) * S)
        qkv_b = qkv[rows, :]                        # (S, 3D)
        qh = jnp.stack([qkv_b[:, h * hd:(h + 1) * hd]
                        for h in range(H)], axis=0).astype(bf16)          # (H,S,hd)
        kh = jnp.stack([qkv_b[:, D + h * hd:D + (h + 1) * hd]
                        for h in range(H)], axis=0).astype(bf16)
        vh = jnp.stack([qkv_b[:, 2 * D + h * hd:2 * D + (h + 1) * hd]
                        for h in range(H)], axis=0).astype(bf16)

        s = jnp.einsum('hqe,hke->hqk', qh, kh,
                       preferred_element_type=f32)                        # (H,S,S)
        s = s + add_mask[b]                         # key-padding mask (1, S) bcast
        s = s - jnp.max(s, axis=-1, keepdims=True)
        p = jnp.exp(s)
        p = p * pl.reciprocal(jnp.sum(p, axis=-1, keepdims=True),
                              approx=True)          # EUP, not VALU divide

        ctx = jnp.einsum('hqk,hke->hqe', p.astype(bf16), vh,
                         preferred_element_type=f32)                      # (H,S,hd)
        for h in range(H):
            ctx_acc[rows, h * hd:(h + 1) * hd] = ctx[h]

    # ---------------- output projection: one (Bt*S,D)x(D,D) matmul ----------
    attn = jnp.dot(ctx_acc[...].astype(bf16), w_out_ref[...],
                   preferred_element_type=f32) + b_out_ref[...]

    # residual + LayerNorm 1 (dropout = identity in eval mode)
    x = _layer_norm(x + attn, ln1_w_ref[...], ln1_b_ref[...])

    # ---------------- feed-forward: Linear -> ReLU -> Linear ---------------
    ff = jnp.dot(x.astype(bf16), w_ff1_ref[...],
                 preferred_element_type=f32) + b_ff1_ref[...]
    ff = jnp.maximum(ff, 0.0)
    ff = jnp.dot(ff.astype(bf16), w_ff2_ref[...],
                 preferred_element_type=f32) + b_ff2_ref[...]

    # residual + LayerNorm 2
    x = _layer_norm(x + ff, ln2_w_ref[...], ln2_b_ref[...])
    x_acc[...] = x

    # ---------------- qa_outputs on the final layer only --------------------
    @pl.when(l == num_layers - 1)
    def _():
        qa_w = qa_w_ref[...]                        # (2, D)
        qa_b = qa_b_ref[...]                        # (2, 1)
        for b in range(Bt):
            xb = x[b * S:(b + 1) * S, :]            # (S, D)
            logits = jnp.einsum('od,sd->os', qa_w, xb,
                                preferred_element_type=f32) + qa_b        # (2, S)
            start_ref[b] = logits[0:1, :]
            end_ref[b] = logits[1:2, :]


def init_params(key, dim, num_layers):
    """Parameters in the native PyTorch layouts."""
    keys = jax.random.split(key, 2 + num_layers)
    emb = 0.02 * jax.random.normal(keys[0], (VOCAB, dim), jnp.float32)
    layers = []
    for i in range(num_layers):
        ks = jax.random.split(keys[1 + i], 4)
        layers.append(dict(
            in_w=0.02 * jax.random.normal(ks[0], (3 * dim, dim), jnp.float32),
            in_b=jnp.zeros((3 * dim,), jnp.float32),
            out_w=0.02 * jax.random.normal(ks[1], (dim, dim), jnp.float32),
            out_b=jnp.zeros((dim,), jnp.float32),
            ln1_w=jnp.ones((dim,), jnp.float32),
            ln1_b=jnp.zeros((dim,), jnp.float32),
            ln2_w=jnp.ones((dim,), jnp.float32),
            ln2_b=jnp.zeros((dim,), jnp.float32),
            ff1_w=0.02 * jax.random.normal(ks[2], (4 * dim, dim), jnp.float32),
            ff1_b=jnp.zeros((4 * dim,), jnp.float32),
            ff2_w=0.02 * jax.random.normal(ks[3], (dim, 4 * dim), jnp.float32),
            ff2_b=jnp.zeros((dim,), jnp.float32),
        ))
    qa_w = 0.02 * jax.random.normal(keys[-1], (2, dim), jnp.float32)
    qa_b = jnp.zeros((2,), jnp.float32)
    return emb, layers, qa_w, qa_b


def pack_params(emb, layers, qa_w, qa_b, num_heads):
    """Stack per-layer weights along a leading layer axis in kernel layouts:
    matmul weights pre-transposed to (in, out) and stored in bf16 (halves the
    weight DMA); the 1/sqrt(head_dim) attention scale is folded into the q
    rows of in_proj weight/bias.  Biases / LN / qa head stay f32."""
    D = emb.shape[1]
    hd = D // num_heads
    scale = 1.0 / math.sqrt(hd)

    def stack(fn, dtype):
        return jnp.stack([fn(ly) for ly in layers], axis=0).astype(dtype)

    def qkv_w(ly):
        w = ly['in_w']                                           # (3D, D): [q; k; v]
        w = jnp.concatenate([w[:D] * scale, w[D:]], axis=0)      # fold attn scale
        return w.T                                               # (D, 3D)

    def qkv_b(ly):
        b = ly['in_b']
        b = jnp.concatenate([b[:D] * scale, b[D:]], axis=0)
        return b.reshape(1, 3 * D)

    return dict(
        emb=emb.astype(jnp.float32),
        w_qkv=stack(qkv_w, jnp.bfloat16),                          # (L, D, 3D)
        b_qkv=stack(qkv_b, jnp.float32),                           # (L, 1, 3D)
        w_out=stack(lambda ly: ly['out_w'].T, jnp.bfloat16),       # (L, D, D)
        b_out=stack(lambda ly: ly['out_b'].reshape(1, D), jnp.float32),
        ln1_w=stack(lambda ly: ly['ln1_w'].reshape(1, D), jnp.float32),
        ln1_b=stack(lambda ly: ly['ln1_b'].reshape(1, D), jnp.float32),
        ln2_w=stack(lambda ly: ly['ln2_w'].reshape(1, D), jnp.float32),
        ln2_b=stack(lambda ly: ly['ln2_b'].reshape(1, D), jnp.float32),
        w_ff1=stack(lambda ly: ly['ff1_w'].T, jnp.bfloat16),       # (L, D, 4D)
        b_ff1=stack(lambda ly: ly['ff1_b'].reshape(1, 4 * D), jnp.float32),
        w_ff2=stack(lambda ly: ly['ff2_w'].T, jnp.bfloat16),       # (L, 4D, D)
        b_ff2=stack(lambda ly: ly['ff2_b'].reshape(1, D), jnp.float32),
        qa_w=qa_w.astype(jnp.float32),                             # (2, D)
        qa_b=qa_b.reshape(2, 1).astype(jnp.float32),               # (2, 1)
    )


def _pick_batch_block(B, S, D):
    """Largest divisor of B (capped so the (Bt*S, D) activation block stays a
    few MiB) -> amortizes per-layer weight DMA over Bt rows per grid step."""
    if S % 8 != 0:
        return B          # keep the block equal to the full array (sublane rule)
    cap = max(1, min(8, (4 << 20) // max(1, S * D * 4)))
    best = 1
    for cand in range(1, min(B, cap) + 1):
        if B % cand == 0:
            best = cand
    return best


def _vmem_limit_bytes():
    """~56 MiB on 64-MiB parts (v7x), capped at 100 MiB on 128-MiB parts."""
    try:
        cap = int(pltpu.get_tpu_info().vmem_capacity_bytes)
    except Exception:
        cap = 64 * 1024 * 1024
    return int(min(100 * 1024 * 1024, max(32 * 1024 * 1024, (cap * 7) // 8)))


def transformer_model_forward(packed, input_ids, attention_mask, token_type_ids,
                              num_heads=8):
    """Mirrors TransformerModel.forward with start/end positions = None."""
    del token_type_ids  # unused by the reference forward as well
    emb = packed['emb']
    B, S = input_ids.shape
    D = emb.shape[1]
    L = packed['w_qkv'].shape[0]

    # glue: embedding gather (vocab-sized table; memory lookup, not the hot path)
    x = jnp.take(emb, input_ids, axis=0).astype(jnp.float32)      # (B, S, D)
    x2d = x.reshape(B * S, D)                                     # flattened rows

    # attention_mask == 1 -> attend (0.0), else pad (-1e9 additive)
    add_mask = jnp.where(attention_mask == 1, 0.0, -1e9).astype(jnp.float32)
    add_mask = add_mask.reshape(B, 1, S)

    Bt = _pick_batch_block(B, S, D)
    NB = B // Bt

    x_spec = pl.BlockSpec((Bt * S, D), lambda nb, l: (nb, 0))
    mask_spec = pl.BlockSpec((Bt, 1, S), lambda nb, l: (nb, 0, 0))

    def layer_spec(arr):
        nd = arr.ndim
        # leading layer dim squeezed out of the kernel ref
        return pl.BlockSpec((None,) + tuple(arr.shape[1:]),
                            lambda nb, l, nd=nd: (l,) + (0,) * (nd - 1))

    def const_spec(arr):
        nd = arr.ndim
        return pl.BlockSpec(tuple(arr.shape), lambda nb, l, nd=nd: (0,) * nd)

    layer_names = ['w_qkv', 'b_qkv', 'w_out', 'b_out', 'ln1_w', 'ln1_b',
                   'ln2_w', 'ln2_b', 'w_ff1', 'b_ff1', 'w_ff2', 'b_ff2']
    layer_args = [packed[n] for n in layer_names]

    in_specs = ([mask_spec, x_spec]
                + [layer_spec(a) for a in layer_args]
                + [const_spec(packed['qa_w']), const_spec(packed['qa_b'])])

    out_spec = pl.BlockSpec((Bt, 1, S), lambda nb, l: (nb, 0, 0))

    kernel = functools.partial(fused_encoder_kernel, num_heads=num_heads)

    start3, end3 = pl.pallas_call(
        kernel,
        grid=(NB, L),                          # batch blocks parallel, layers sequential
        in_specs=in_specs,
        out_specs=(out_spec, out_spec),
        out_shape=(jax.ShapeDtypeStruct((B, 1, S), jnp.float32),
                   jax.ShapeDtypeStruct((B, 1, S), jnp.float32)),
        scratch_shapes=[pltpu.VMEM((Bt * S, D), jnp.float32),   # resident activation
                        pltpu.VMEM((Bt * S, D), jnp.float32)],  # attention context
        compiler_params=pltpu.CompilerParams(
            dimension_semantics=("parallel", "arbitrary"),
            vmem_limit_bytes=_vmem_limit_bytes()),
    )(add_mask, x2d, *layer_args, packed['qa_w'], packed['qa_b'])

    start_logits = start3[:, 0, :]            # (B, S)
    end_logits = end3[:, 0, :]                # (B, S)
    # TODO(synk): CrossEntropyLoss path (start_positions/end_positions given)
    # is not implemented; this reproduces the inference branch of forward().
    return start_logits, end_logits


if __name__ == "__main__":
    DIM = 32
    NUM_HEADS = 8
    NUM_LAYERS = 2
    B, S = 2, 8

    key = jax.random.PRNGKey(0)
    k_param, k_ids = jax.random.split(key)

    emb, layers, qa_w, qa_b = init_params(k_param, DIM, NUM_LAYERS)
    packed = pack_params(emb, layers, qa_w, qa_b, NUM_HEADS)

    input_ids = jax.random.randint(k_ids, (B, S), 0, VOCAB, dtype=jnp.int32)
    attention_mask = jnp.array(
        [[1, 1, 1, 1, 1, 1, 1, 1],
         [1, 1, 1, 1, 1, 0, 0, 0]], dtype=jnp.int32)
    token_type_ids = jnp.zeros((B, S), dtype=jnp.int32)

    fwd = jax.jit(transformer_model_forward, static_argnames=("num_heads",))
    start_logits, end_logits = fwd(packed, input_ids, attention_mask,
                                   token_type_ids, num_heads=NUM_HEADS)
    jax.block_until_ready((start_logits, end_logits))

    assert start_logits.shape == (B, S) and end_logits.shape == (B, S)
    assert bool(jnp.all(jnp.isfinite(start_logits)))
    assert bool(jnp.all(jnp.isfinite(end_logits)))
    print("KERNEL_OK")
</pallas_src>

<mosaic_0001>
module attributes {stable_mosaic.version = 11 : i64} {
  func.func @fused_encoder_kernel(%arg0: i32, %arg1: i32, %arg2: memref<2x1x8xf32, #tpu.memory_space<vmem>>, %arg3: memref<16x32xf32, #tpu.memory_space<vmem>>, %arg4: memref<1x32x96xbf16, #tpu.memory_space<vmem>>, %arg5: memref<1x1x96xf32, #tpu.memory_space<vmem>>, %arg6: memref<1x32x32xbf16, #tpu.memory_space<vmem>>, %arg7: memref<1x1x32xf32, #tpu.memory_space<vmem>>, %arg8: memref<1x1x32xf32, #tpu.memory_space<vmem>>, %arg9: memref<1x1x32xf32, #tpu.memory_space<vmem>>, %arg10: memref<1x1x32xf32, #tpu.memory_space<vmem>>, %arg11: memref<1x1x32xf32, #tpu.memory_space<vmem>>, %arg12: memref<1x32x128xbf16, #tpu.memory_space<vmem>>, %arg13: memref<1x1x128xf32, #tpu.memory_space<vmem>>, %arg14: memref<1x128x32xbf16, #tpu.memory_space<vmem>>, %arg15: memref<1x1x32xf32, #tpu.memory_space<vmem>>, %arg16: memref<2x32xf32, #tpu.memory_space<vmem>>, %arg17: memref<2x1xf32, #tpu.memory_space<vmem>>, %arg18: memref<2x1x8xf32, #tpu.memory_space<vmem>>, %arg19: memref<2x1x8xf32, #tpu.memory_space<vmem>>, %arg20: memref<16x32xf32, #tpu.memory_space<vmem>>, %arg21: memref<16x32xf32, #tpu.memory_space<vmem>>) attributes {dimension_semantics = [#tpu.dimension_semantics<parallel>, #tpu.dimension_semantics<arbitrary>], iteration_bounds = array<i64: 1, 2>, scalar_prefetch = 0 : i64, scratch_operands = 2 : i64, tpu.core_type = #tpu.core_type<tc>, window_params = [{transform_indices = @transform_0, window_bounds = array<i64: 2, 1, 8>}, {transform_indices = @transform_1, window_bounds = array<i64: 16, 32>}, {transform_indices = @transform_2, window_bounds = array<i64: 1, 32, 96>}, {transform_indices = @transform_3, window_bounds = array<i64: 1, 1, 96>}, {transform_indices = @transform_4, window_bounds = array<i64: 1, 32, 32>}, {transform_indices = @transform_5, window_bounds = array<i64: 1, 1, 32>}, {transform_indices = @transform_6, window_bounds = array<i64: 1, 1, 32>}, {transform_indices = @transform_7, window_bounds = array<i64: 1, 1, 32>}, {transform_indices = @transform_8, window_bounds = array<i64: 1, 1, 32>}, {transform_indices = @transform_9, window_bounds = array<i64: 1, 1, 32>}, {transform_indices = @transform_10, window_bounds = array<i64: 1, 32, 128>}, {transform_indices = @transform_11, window_bounds = array<i64: 1, 1, 128>}, {transform_indices = @transform_12, window_bounds = array<i64: 1, 128, 32>}, {transform_indices = @transform_13, window_bounds = array<i64: 1, 1, 32>}, {pipeline_mode = #tpu.pipeline_mode<synchronous>, transform_indices = @transform_14, window_bounds = array<i64: 2, 32>}, {pipeline_mode = #tpu.pipeline_mode<synchronous>, transform_indices = @transform_15, window_bounds = array<i64: 2, 1>}, {transform_indices = @transform_16, window_bounds = array<i64: 2, 1, 8>}, {transform_indices = @transform_17, window_bounds = array<i64: 2, 1, 8>}]} {
    %c0_i32 = arith.constant 0 : i32
    %0 = arith.cmpi eq, %arg1, %c0_i32 : i32
    %1 = arith.extui %0 : i1 to i32
    %c0_i32_0 = arith.constant 0 : i32
    %2 = arith.cmpi ne, %1, %c0_i32_0 : i32
    scf.if %2 {
      %c0_93 = arith.constant 0 : index
      %c0_94 = arith.constant 0 : index
      %292 = vector.load %arg3[%c0_93, %c0_94] : memref<16x32xf32, #tpu.memory_space<vmem>>, vector<16x32xf32>
      %c0_95 = arith.constant 0 : index
      %c0_96 = arith.constant 0 : index
      %293 = vector.load %arg20[%c0_95, %c0_96] : memref<16x32xf32, #tpu.memory_space<vmem>>, vector<16x32xf32>
      tpu.vector_store %arg20[%c0_95, %c0_96], %292 {strides = array<i32>} : memref<16x32xf32, #tpu.memory_space<vmem>>, vector<16x32xf32>,
    } else {
    }
    %c0 = arith.constant 0 : index
    %c0_1 = arith.constant 0 : index
    %3 = vector.load %arg20[%c0, %c0_1] : memref<16x32xf32, #tpu.memory_space<vmem>>, vector<16x32xf32>
    %4 = arith.truncf %3 : vector<16x32xf32> to vector<16x32xbf16>
    %c0_2 = arith.constant 0 : index
    %c0_3 = arith.constant 0 : index
    %c0_4 = arith.constant 0 : index
    %5 = vector.load %arg2[%c0_2, %c0_3, %c0_4] : memref<2x1x8xf32, #tpu.memory_space<vmem>>, vector<2x1x8xf32>
    %c0_5 = arith.constant 0 : index
    %c0_6 = arith.constant 0 : index
    %c0_7 = arith.constant 0 : index
    %6 = vector.load %arg4[%c0_5, %c0_6, %c0_7] : memref<1x32x96xbf16, #tpu.memory_space<vmem>>, vector<1x32x96xbf16>
    %7 = vector.shape_cast %6 : vector<1x32x96xbf16> to vector<32x96xbf16>
    %cst = arith.constant dense<0.000000e+00> : vector<16x96xf32>
    %8 = tpu.matmul %4, %7, %cst {dimension_numbers = #tpu.dot_dimension_numbers<[1], [0], [0], [1], [0, 0, 1, 1], [], []>} : vector<16x32xbf16>, vector<32x96xbf16>, vector<16x96xf32> -> vector<16x96xf32>
    %c0_8 = arith.constant 0 : index
    %c0_9 = arith.constant 0 : index
    %c0_10 = arith.constant 0 : index
    %9 = vector.load %arg5[%c0_8, %c0_9, %c0_10] : memref<1x1x96xf32, #tpu.memory_space<vmem>>, vector<1x1x96xf32>
    %10 = vector.shape_cast %9 : vector<1x1x96xf32> to vector<1x96xf32>
    %11 = vector.broadcast %10 : vector<1x96xf32> to vector<16x96xf32>
    %12 = arith.addf %8, %11 : vector<16x96xf32>
    %13 = vector.extract_strided_slice %12 {offsets = [0, 0], sizes = [8, 96], strides = [1, 1]} : vector<16x96xf32> to vector<8x96xf32>
    %14 = vector.extract_strided_slice %13 {offsets = [0, 0], sizes = [8, 4], strides = [1, 1]} : vector<8x96xf32> to vector<8x4xf32>
    %15 = vector.extract_strided_slice %13 {offsets = [0, 4], sizes = [8, 4], strides = [1, 1]} : vector<8x96xf32> to vector<8x4xf32>
    %16 = vector.extract_strided_slice %13 {offsets = [0, 8], sizes = [8, 4], strides = [1, 1]} : vector<8x96xf32> to vector<8x4xf32>
    %17 = vector.extract_strided_slice %13 {offsets = [0, 12], sizes = [8, 4], strides = [1, 1]} : vector<8x96xf32> to vector<8x4xf32>
    %18 = vector.extract_strided_slice %13 {offsets = [0, 16], sizes = [8, 4], strides = [1, 1]} : vector<8x96xf32> to vector<8x4xf32>
    %19 = vector.extract_strided_slice %13 {offsets = [0, 20], sizes = [8, 4], strides = [1, 1]} : vector<8x96xf32> to vector<8x4xf32>
    %20 = vector.extract_strided_slice %13 {offsets = [0, 24], sizes = [8, 4], strides = [1, 1]} : vector<8x96xf32> to vector<8x4xf32>
    %21 = vector.extract_strided_slice %13 {offsets = [0, 28], sizes = [8, 4], strides = [1, 1]} : vector<8x96xf32> to vector<8x4xf32>
    %22 = vector.shape_cast %14 : vector<8x4xf32> to vector<1x8x4xf32>
    %23 = vector.shape_cast %15 : vector<8x4xf32> to vector<1x8x4xf32>
    %24 = vector.shape_cast %16 : vector<8x4xf32> to vector<1x8x4xf32>
    %25 = vector.shape_cast %17 : vector<8x4xf32> to vector<1x8x4xf32>
    %26 = vector.shape_cast %18 : vector<8x4xf32> to vector<1x8x4xf32>
    %27 = vector.shape_cast %19 : vector<8x4xf32> to vector<1x8x4xf32>
    %28 = vector.shape_cast %20 : vector<8x4xf32> to vector<1x8x4xf32>
    %29 = vector.shape_cast %21 : vector<8x4xf32> to vector<1x8x4xf32>
    %30 = tpu.concatenate %22, %23, %24, %25, %26, %27, %28, %29 in 0 : vector<1x8x4xf32>, vector<1x8x4xf32>, vector<1x8x4xf32>, vector<1x8x4xf32>, vector<1x8x4xf32>, vector<1x8x4xf32>, vector<1x8x4xf32>, vector<1x8x4xf32> -> vector<8x8x4xf32>
    %31 = arith.truncf %30 : vector<8x8x4xf32> to vector<8x8x4xbf16>
    %32 = vector.extract_strided_slice %13 {offsets = [0, 32], sizes = [8, 4], strides = [1, 1]} : vector<8x96xf32> to vector<8x4xf32>
    %33 = vector.extract_strided_slice %13 {offsets = [0, 36], sizes = [8, 4], strides = [1, 1]} : vector<8x96xf32> to vector<8x4xf32>
    %34 = vector.extract_strided_slice %13 {offsets = [0, 40], sizes = [8, 4], strides = [1, 1]} : vector<8x96xf32> to vector<8x4xf32>
    %35 = vector.extract_strided_slice %13 {offsets = [0, 44], sizes = [8, 4], strides = [1, 1]} : vector<8x96xf32> to vector<8x4xf32>
    %36 = vector.extract_strided_slice %13 {offsets = [0, 48], sizes = [8, 4], strides = [1, 1]} : vector<8x96xf32> to vector<8x4xf32>
    %37 = vector.extract_strided_slice %13 {offsets = [0, 52], sizes = [8, 4], strides = [1, 1]} : vector<8x96xf32> to vector<8x4xf32>
    %38 = vector.extract_strided_slice %13 {offsets = [0, 56], sizes = [8, 4], strides = [1, 1]} : vector<8x96xf32> to vector<8x4xf32>
    %39 = vector.extract_strided_slice %13 {offsets = [0, 60], sizes = [8, 4], strides = [1, 1]} : vector<8x96xf32> to vector<8x4xf32>
    %40 = vector.shape_cast %32 : vector<8x4xf32> to vector<1x8x4xf32>
    %41 = vector.shape_cast %33 : vector<8x4xf32> to vector<1x8x4xf32>
    %42 = vector.shape_cast %34 : vector<8x4xf32> to vector<1x8x4xf32>
    %43 = vector.shape_cast %35 : vector<8x4xf32> to vector<1x8x4xf32>
    %44 = vector.shape_cast %36 : vector<8x4xf32> to vector<1x8x4xf32>
    %45 = vector.shape_cast %37 : vector<8x4xf32> to vector<1x8x4xf32>
    %46 = vector.shape_cast %38 : vector<8x4xf32> to vector<1x8x4xf32>
    %47 = vector.shape_cast %39 : vector<8x4xf32> to vector<1x8x4xf32>
    %48 = tpu.concatenate %40, %41, %42, %43, %44, %45, %46, %47 in 0 : vector<1x8x4xf32>, vector<1x8x4xf32>, vector<1x8x4xf32>, vector<1x8x4xf32>, vector<1x8x4xf32>, vector<1x8x4xf32>, vector<1x8x4xf32>, vector<1x8x4xf32> -> vector<8x8x4xf32>
    %49 = arith.truncf %48 : vector<8x8x4xf32> to vector<8x8x4xbf16>
    %50 = vector.extract_strided_slice %13 {offsets = [0, 64], sizes = [8, 4], strides = [1, 1]} : vector<8x96xf32> to vector<8x4xf32>
    %51 = vector.extract_strided_slice %13 {offsets = [0, 68], sizes = [8, 4], strides = [1, 1]} : vector<8x96xf32> to vector<8x4xf32>
    %52 = vector.extract_strided_slice %13 {offsets = [0, 72], sizes = [8, 4], strides = [1, 1]} : vector<8x96xf32> to vector<8x4xf32>
    %53 = vector.extract_strided_slice %13 {offsets = [0, 76], sizes = [8, 4], strides = [1, 1]} : vector<8x96xf32> to vector<8x4xf32>
    %54 = vector.extract_strided_slice %13 {offsets = [0, 80], sizes = [8, 4], strides = [1, 1]} : vector<8x96xf32> to vector<8x4xf32>
    %55 = vector.extract_strided_slice %13 {offsets = [0, 84], sizes = [8, 4], strides = [1, 1]} : vector<8x96xf32> to vector<8x4xf32>
    %56 = vector.extract_strided_slice %13 {offsets = [0, 88], sizes = [8, 4], strides = [1, 1]} : vector<8x96xf32> to vector<8x4xf32>
    %57 = vector.extract_strided_slice %13 {offsets = [0, 92], sizes = [8, 4], strides = [1, 1]} : vector<8x96xf32> to vector<8x4xf32>
    %58 = vector.shape_cast %50 : vector<8x4xf32> to vector<1x8x4xf32>
    %59 = vector.shape_cast %51 : vector<8x4xf32> to vector<1x8x4xf32>
    %60 = vector.shape_cast %52 : vector<8x4xf32> to vector<1x8x4xf32>
    %61 = vector.shape_cast %53 : vector<8x4xf32> to vector<1x8x4xf32>
    %62 = vector.shape_cast %54 : vector<8x4xf32> to vector<1x8x4xf32>
    %63 = vector.shape_cast %55 : vector<8x4xf32> to vector<1x8x4xf32>
    %64 = vector.shape_cast %56 : vector<8x4xf32> to vector<1x8x4xf32>
    %65 = vector.shape_cast %57 : vector<8x4xf32> to vector<1x8x4xf32>
    %66 = tpu.concatenate %58, %59, %60, %61, %62, %63, %64, %65 in 0 : vector<1x8x4xf32>, vector<1x8x4xf32>, vector<1x8x4xf32>, vector<1x8x4xf32>, vector<1x8x4xf32>, vector<1x8x4xf32>, vector<1x8x4xf32>, vector<1x8x4xf32> -> vector<8x8x4xf32>
    %67 = arith.truncf %66 : vector<8x8x4xf32> to vector<8x8x4xbf16>
    "tpu.trace_start"() <{level = 10 : i32, message = "hqe,hke->hqk"}> : () -> ()
    %cst_11 = arith.constant dense<0.000000e+00> : vector<8x8x8xf32>
    %68 = tpu.matmul %31, %49, %cst_11 {dimension_numbers = #tpu.dot_dimension_numbers<[2], [2], [1], [1], [0, 0, 0, 1, 1, 1], [0], [0]>} : vector<8x8x4xbf16>, vector<8x8x4xbf16>, vector<8x8x8xf32> -> vector<8x8x8xf32>
    "tpu.trace_stop"() : () -> ()
    %69 = vector.extract_strided_slice %5 {offsets = [0, 0, 0], sizes = [1, 1, 8], strides = [1, 1, 1]} : vector<2x1x8xf32> to vector<1x1x8xf32>
    %70 = vector.shape_cast %69 : vector<1x1x8xf32> to vector<1x8xf32>
    %71 = vector.shape_cast %70 : vector<1x8xf32> to vector<1x1x8xf32>
    %72 = vector.broadcast %71 : vector<1x1x8xf32> to vector<8x8x8xf32>
    %73 = arith.addf %68, %72 : vector<8x8x8xf32>
    %cst_12 = arith.constant dense<0xFF800000> : vector<8x8xf32>
    %74 = vector.multi_reduction <maximumf>, %73, %cst_12 [2] : vector<8x8x8xf32> to vector<8x8xf32>
    %75 = vector.shape_cast %74 : vector<8x8xf32> to vector<8x8x1xf32>
    %76 = vector.broadcast %75 : vector<8x8x1xf32> to vector<8x8x8xf32>
    %77 = arith.subf %73, %76 : vector<8x8x8xf32>
    %78 = math.exp %77 : vector<8x8x8xf32>
    %cst_13 = arith.constant dense<0.000000e+00> : vector<8x8xf32>
    %79 = vector.multi_reduction <add>, %78, %cst_13 [2] : vector<8x8x8xf32> to vector<8x8xf32>
    %80 = vector.shape_cast %79 : vector<8x8xf32> to vector<8x8x1xf32>
    %81 = tpu.reciprocal %80 {approx = true} : vector<8x8x1xf32> -> vector<8x8x1xf32>
    %82 = vector.broadcast %81 : vector<8x8x1xf32> to vector<8x8x8xf32>
    %83 = arith.mulf %78, %82 : vector<8x8x8xf32>
    %84 = arith.truncf %83 : vector<8x8x8xf32> to vector<8x8x8xbf16>
    "tpu.trace_start"() <{level = 10 : i32, message = "hqk,hke->hqe"}> : () -> ()
    %cst_14 = arith.constant dense<0.000000e+00> : vector<8x8x4xf32>
    %85 = tpu.matmul %84, %67, %cst_14 {dimension_numbers = #tpu.dot_dimension_numbers<[2], [1], [1], [2], [0, 0, 0, 1, 1, 2], [0], [0]>} : vector<8x8x8xbf16>, vector<8x8x4xbf16>, vector<8x8x4xf32> -> vector<8x8x4xf32>
    "tpu.trace_stop"() : () -> ()
    %86 = vector.extract_strided_slice %85 {offsets = [0, 0, 0], sizes = [1, 8, 4], strides = [1, 1, 1]} : vector<8x8x4xf32> to vector<1x8x4xf32>
    %87 = vector.shape_cast %86 : vector<1x8x4xf32> to vector<8x4xf32>
    %c0_15 = arith.constant 0 : index
    %c0_16 = arith.constant 0 : index
    %88 = vector.load %arg21[%c0_15, %c0_16] : memref<16x32xf32, #tpu.memory_space<vmem>>, vector<8x4xf32>
    tpu.vector_store %arg21[%c0_15, %c0_16], %87 {strides = array<i32>} : memref<16x32xf32, #tpu.memory_space<vmem>>, vector<8x4xf32>,
    %89 = vector.extract_strided_slice %85 {offsets = [1, 0, 0], sizes = [1, 8, 4], strides = [1, 1, 1]} : vector<8x8x4xf32> to vector<1x8x4xf32>
    %90 = vector.shape_cast %89 : vector<1x8x4xf32> to vector<8x4xf32>
    %c0_17 = arith.constant 0 : index
    %c4 = arith.constant 4 : index
    %91 = vector.load %arg21[%c0_17, %c4] : memref<16x32xf32, #tpu.memory_space<vmem>>, vector<8x4xf32>
    tpu.vector_store %arg21[%c0_17, %c4], %90 {strides = array<i32>} : memref<16x32xf32, #tpu.memory_space<vmem>>, vector<8x4xf32>,
    %92 = vector.extract_strided_slice %85 {offsets = [2, 0, 0], sizes = [1, 8, 4], strides = [1, 1, 1]} : vector<8x8x4xf32> to vector<1x8x4xf32>
    %93 = vector.shape_cast %92 : vector<1x8x4xf32> to vector<8x4xf32>
    %c0_18 = arith.constant 0 : index
    %c8 = arith.constant 8 : index
    %94 = vector.load %arg21[%c0_18, %c8] : memref<16x32xf32, #tpu.memory_space<vmem>>, vector<8x4xf32>
    tpu.vector_store %arg21[%c0_18, %c8], %93 {strides = array<i32>} : memref<16x32xf32, #tpu.memory_space<vmem>>, vector<8x4xf32>,
    %95 = vector.extract_strided_slice %85 {offsets = [3, 0, 0], sizes = [1, 8, 4], strides = [1, 1, 1]} : vector<8x8x4xf32> to vector<1x8x4xf32>
    %96 = vector.shape_cast %95 : vector<1x8x4xf32> to vector<8x4xf32>
    %c0_19 = arith.constant 0 : index
    %c12 = arith.constant 12 : index
    %97 = vector.load %arg21[%c0_19, %c12] : memref<16x32xf32, #tpu.memory_space<vmem>>, vector<8x4xf32>
    tpu.vector_store %arg21[%c0_19, %c12], %96 {strides = array<i32>} : memref<16x32xf32, #tpu.memory_space<vmem>>, vector<8x4xf32>,
    %98 = vector.extract_strided_slice %85 {offsets = [4, 0, 0], sizes = [1, 8, 4], strides = [1, 1, 1]} : vector<8x8x4xf32> to vector<1x8x4xf32>
    %99 = vector.shape_cast %98 : vector<1x8x4xf32> to vector<8x4xf32>
    %c0_20 = arith.constant 0 : index
    %c16 = arith.constant 16 : index
    %100 = vector.load %arg21[%c0_20, %c16] : memref<16x32xf32, #tpu.memory_space<vmem>>, vector<8x4xf32>
    tpu.vector_store %arg21[%c0_20, %c16], %99 {strides = array<i32>} : memref<16x32xf32, #tpu.memory_space<vmem>>, vector<8x4xf32>,
    %101 = vector.extract_strided_slice %85 {offsets = [5, 0, 0], sizes = [1, 8, 4], strides = [1, 1, 1]} : vector<8x8x4xf32> to vector<1x8x4xf32>
    %102 = vector.shape_cast %101 : vector<1x8x4xf32> to vector<8x4xf32>
    %c0_21 = arith.constant 0 : index
    %c20 = arith.constant 20 : index
    %103 = vector.load %arg21[%c0_21, %c20] : memref<16x32xf32, #tpu.memory_space<vmem>>, vector<8x4xf32>
    tpu.vector_store %arg21[%c0_21, %c20], %102 {strides = array<i32>} : memref<16x32xf32, #tpu.memory_space<vmem>>, vector<8x4xf32>,
    %104 = vector.extract_strided_slice %85 {offsets = [6, 0, 0], sizes = [1, 8, 4], strides = [1, 1, 1]} : vector<8x8x4xf32> to vector<1x8x4xf32>
    %105 = vector.shape_cast %104 : vector<1x8x4xf32> to vector<8x4xf32>
    %c0_22 = arith.constant 0 : index
    %c24 = arith.constant 24 : index
    %106 = vector.load %arg21[%c0_22, %c24] : memref<16x32xf32, #tpu.memory_space<vmem>>, vector<8x4xf32>
    tpu.vector_store %arg21[%c0_22, %c24], %105 {strides = array<i32>} : memref<16x32xf32, #tpu.memory_space<vmem>>, vector<8x4xf32>,
    %107 = vector.extract_strided_slice %85 {offsets = [7, 0, 0], sizes = [1, 8, 4], strides = [1, 1, 1]} : vector<8x8x4xf32> to vector<1x8x4xf32>
    %108 = vector.shape_cast %107 : vector<1x8x4xf32> to vector<8x4xf32>
    %c0_23 = arith.constant 0 : index
    %c28 = arith.constant 28 : index
    %109 = vector.load %arg21[%c0_23, %c28] : memref<16x32xf32, #tpu.memory_space<vmem>>, vector<8x4xf32>
    tpu.vector_store %arg21[%c0_23, %c28], %108 {strides = array<i32>} : memref<16x32xf32, #tpu.memory_space<vmem>>, vector<8x4xf32>,
    %110 = vector.extract_strided_slice %12 {offsets = [8, 0], sizes = [8, 96], strides = [1, 1]} : vector<16x96xf32> to vector<8x96xf32>
    %111 = vector.extract_strided_slice %110 {offsets = [0, 0], sizes = [8, 4], strides = [1, 1]} : vector<8x96xf32> to vector<8x4xf32>
    %112 = vector.extract_strided_slice %110 {offsets = [0, 4], sizes = [8, 4], strides = [1, 1]} : vector<8x96xf32> to vector<8x4xf32>
    %113 = vector.extract_strided_slice %110 {offsets = [0, 8], sizes = [8, 4], strides = [1, 1]} : vector<8x96xf32> to vector<8x4xf32>
    %114 = vector.extract_strided_slice %110 {offsets = [0, 12], sizes = [8, 4], strides = [1, 1]} : vector<8x96xf32> to vector<8x4xf32>
    %115 = vector.extract_strided_slice %110 {offsets = [0, 16], sizes = [8, 4], strides = [1, 1]} : vector<8x96xf32> to vector<8x4xf32>
    %116 = vector.extract_strided_slice %110 {offsets = [0, 20], sizes = [8, 4], strides = [1, 1]} : vector<8x96xf32> to vector<8x4xf32>
    %117 = vector.extract_strided_slice %110 {offsets = [0, 24], sizes = [8, 4], strides = [1, 1]} : vector<8x96xf32> to vector<8x4xf32>
    %118 = vector.extract_strided_slice %110 {offsets = [0, 28], sizes = [8, 4], strides = [1, 1]} : vector<8x96xf32> to vector<8x4xf32>
    %119 = vector.shape_cast %111 : vector<8x4xf32> to vector<1x8x4xf32>
    %120 = vector.shape_cast %112 : vector<8x4xf32> to vector<1x8x4xf32>
    %121 = vector.shape_cast %113 : vector<8x4xf32> to vector<1x8x4xf32>
    %122 = vector.shape_cast %114 : vector<8x4xf32> to vector<1x8x4xf32>
    %123 = vector.shape_cast %115 : vector<8x4xf32> to vector<1x8x4xf32>
    %124 = vector.shape_cast %116 : vector<8x4xf32> to vector<1x8x4xf32>
    %125 = vector.shape_cast %117 : vector<8x4xf32> to vector<1x8x4xf32>
    %126 = vector.shape_cast %118 : vector<8x4xf32> to vector<1x8x4xf32>
    %127 = tpu.concatenate %119, %120, %121, %122, %123, %124, %125, %126 in 0 : vector<1x8x4xf32>, vector<1x8x4xf32>, vector<1x8x4xf32>, vector<1x8x4xf32>, vector<1x8x4xf32>, vector<1x8x4xf32>, vector<1x8x4xf32>, vector<1x8x4xf32> -> vector<8x8x4xf32>
    %128 = arith.truncf %127 : vector<8x8x4xf32> to vector<8x8x4xbf16>
    %129 = vector.extract_strided_slice %110 {offsets = [0, 32], sizes = [8, 4], strides = [1, 1]} : vector<8x96xf32> to vector<8x4xf32>
    %130 = vector.extract_strided_slice %110 {offsets = [0, 36], sizes = [8, 4], strides = [1, 1]} : vector<8x96xf32> to vector<8x4xf32>
    %131 = vector.extract_strided_slice %110 {offsets = [0, 40], sizes = [8, 4], strides = [1, 1]} : vector<8x96xf32> to vector<8x4xf32>
    %132 = vector.extract_strided_slice %110 {offsets = [0, 44], sizes = [8, 4], strides = [1, 1]} : vector<8x96xf32> to vector<8x4xf32>
    %133 = vector.extract_strided_slice %110 {offsets = [0, 48], sizes = [8, 4], strides = [1, 1]} : vector<8x96xf32> to vector<8x4xf32>
    %134 = vector.extract_strided_slice %110 {offsets = [0, 52], sizes = [8, 4], strides = [1, 1]} : vector<8x96xf32> to vector<8x4xf32>
    %135 = vector.extract_strided_slice %110 {offsets = [0, 56], sizes = [8, 4], strides = [1, 1]} : vector<8x96xf32> to vector<8x4xf32>
    %136 = vector.extract_strided_slice %110 {offsets = [0, 60], sizes = [8, 4], strides = [1, 1]} : vector<8x96xf32> to vector<8x4xf32>
    %137 = vector.shape_cast %129 : vector<8x4xf32> to vector<1x8x4xf32>
    %138 = vector.shape_cast %130 : vector<8x4xf32> to vector<1x8x4xf32>
    %139 = vector.shape_cast %131 : vector<8x4xf32> to vector<1x8x4xf32>
    %140 = vector.shape_cast %132 : vector<8x4xf32> to vector<1x8x4xf32>
    %141 = vector.shape_cast %133 : vector<8x4xf32> to vector<1x8x4xf32>
    %142 = vector.shape_cast %134 : vector<8x4xf32> to vector<1x8x4xf32>
    %143 = vector.shape_cast %135 : vector<8x4xf32> to vector<1x8x4xf32>
    %144 = vector.shape_cast %136 : vector<8x4xf32> to vector<1x8x4xf32>
    %145 = tpu.concatenate %137, %138, %139, %140, %141, %142, %143, %144 in 0 : vector<1x8x4xf32>, vector<1x8x4xf32>, vector<1x8x4xf32>, vector<1x8x4xf32>, vector<1x8x4xf32>, vector<1x8x4xf32>, vector<1x8x4xf32>, vector<1x8x4xf32> -> vector<8x8x4xf32>
    %146 = arith.truncf %145 : vector<8x8x4xf32> to vector<8x8x4xbf16>
    %147 = vector.extract_strided_slice %110 {offsets = [0, 64], sizes = [8, 4], strides = [1, 1]} : vector<8x96xf32> to vector<8x4xf32>
    %148 = vector.extract_strided_slice %110 {offsets = [0, 68], sizes = [8, 4], strides = [1, 1]} : vector<8x96xf32> to vector<8x4xf32>
    %149 = vector.extract_strided_slice %110 {offsets = [0, 72], sizes = [8, 4], strides = [1, 1]} : vector<8x96xf32> to vector<8x4xf32>
    %150 = vector.extract_strided_slice %110 {offsets = [0, 76], sizes = [8, 4], strides = [1, 1]} : vector<8x96xf32> to vector<8x4xf32>
    %151 = vector.extract_strided_slice %110 {offsets = [0, 80], sizes = [8, 4], strides = [1, 1]} : vector<8x96xf32> to vector<8x4xf32>
    %152 = vector.extract_strided_slice %110 {offsets = [0, 84], sizes = [8, 4], strides = [1, 1]} : vector<8x96xf32> to vector<8x4xf32>
    %153 = vector.extract_strided_slice %110 {offsets = [0, 88], sizes = [8, 4], strides = [1, 1]} : vector<8x96xf32> to vector<8x4xf32>
    %154 = vector.extract_strided_slice %110 {offsets = [0, 92], sizes = [8, 4], strides = [1, 1]} : vector<8x96xf32> to vector<8x4xf32>
    %155 = vector.shape_cast %147 : vector<8x4xf32> to vector<1x8x4xf32>
    %156 = vector.shape_cast %148 : vector<8x4xf32> to vector<1x8x4xf32>
    %157 = vector.shape_cast %149 : vector<8x4xf32> to vector<1x8x4xf32>
    %158 = vector.shape_cast %150 : vector<8x4xf32> to vector<1x8x4xf32>
    %159 = vector.shape_cast %151 : vector<8x4xf32> to vector<1x8x4xf32>
    %160 = vector.shape_cast %152 : vector<8x4xf32> to vector<1x8x4xf32>
    %161 = vector.shape_cast %153 : vector<8x4xf32> to vector<1x8x4xf32>
    %162 = vector.shape_cast %154 : vector<8x4xf32> to vector<1x8x4xf32>
    %163 = tpu.concatenate %155, %156, %157, %158, %159, %160, %161, %162 in 0 : vector<1x8x4xf32>, vector<1x8x4xf32>, vector<1x8x4xf32>, vector<1x8x4xf32>, vector<1x8x4xf32>, vector<1x8x4xf32>, vector<1x8x4xf32>, vector<1x8x4xf32> -> vector<8x8x4xf32>
    %164 = arith.truncf %163 : vector<8x8x4xf32> to vector<8x8x4xbf16>
    "tpu.trace_start"() <{level = 10 : i32, message = "hqe,hke->hqk"}> : () -> ()
    %cst_24 = arith.constant dense<0.000000e+00> : vector<8x8x8xf32>
    %165 = tpu.matmul %128, %146, %cst_24 {dimension_numbers = #tpu.dot_dimension_numbers<[2], [2], [1], [1], [0, 0, 0, 1, 1, 1], [0], [0]>} : vector<8x8x4xbf16>, vector<8x8x4xbf16>, vector<8x8x8xf32> -> vector<8x8x8xf32>
    "tpu.trace_stop"() : () -> ()
    %166 = vector.extract_strided_slice %5 {offsets = [1, 0, 0], sizes = [1, 1, 8], strides = [1, 1, 1]} : vector<2x1x8xf32> to vector<1x1x8xf32>
    %167 = vector.shape_cast %166 : vector<1x1x8xf32> to vector<1x8xf32>
    %168 = vector.shape_cast %167 : vector<1x8xf32> to vector<1x1x8xf32>
    %169 = vector.broadcast %168 : vector<1x1x8xf32> to vector<8x8x8xf32>
    %170 = arith.addf %165, %169 : vector<8x8x8xf32>
    %cst_25 = arith.constant dense<0xFF800000> : vector<8x8xf32>
    %171 = vector.multi_reduction <maximumf>, %170, %cst_25 [2] : vector<8x8x8xf32> to vector<8x8xf32>
    %172 = vector.shape_cast %171 : vector<8x8xf32> to vector<8x8x1xf32>
    %173 = vector.broadcast %172 : vector<8x8x1xf32> to vector<8x8x8xf32>
    %174 = arith.subf %170, %173 : vector<8x8x8xf32>
    %175 = math.exp %174 : vector<8x8x8xf32>
    %cst_26 = arith.constant dense<0.000000e+00> : vector<8x8xf32>
    %176 = vector.multi_reduction <add>, %175, %cst_26 [2] : vector<8x8x8xf32> to vector<8x8xf32>
    %177 = vector.shape_cast %176 : vector<8x8xf32> to vector<8x8x1xf32>
    %178 = tpu.reciprocal %177 {approx = true} : vector<8x8x1xf32> -> vector<8x8x1xf32>
    %179 = vector.broadcast %178 : vector<8x8x1xf32> to vector<8x8x8xf32>
    %180 = arith.mulf %175, %179 : vector<8x8x8xf32>
    %181 = arith.truncf %180 : vector<8x8x8xf32> to vector<8x8x8xbf16>
    "tpu.trace_start"() <{level = 10 : i32, message = "hqk,hke->hqe"}> : () -> ()
    %cst_27 = arith.constant dense<0.000000e+00> : vector<8x8x4xf32>
    %182 = tpu.matmul %181, %164, %cst_27 {dimension_numbers = #tpu.dot_dimension_numbers<[2], [1], [1], [2], [0, 0, 0, 1, 1, 2], [0], [0]>} : vector<8x8x8xbf16>, vector<8x8x4xbf16>, vector<8x8x4xf32> -> vector<8x8x4xf32>
    "tpu.trace_stop"() : () -> ()
    %183 = vector.extract_strided_slice %182 {offsets = [0, 0, 0], sizes = [1, 8, 4], strides = [1, 1, 1]} : vector<8x8x4xf32> to vector<1x8x4xf32>
    %184 = vector.shape_cast %183 : vector<1x8x4xf32> to vector<8x4xf32>
    %c8_28 = arith.constant 8 : index
    %c0_29 = arith.constant 0 : index
    %185 = vector.load %arg21[%c8_28, %c0_29] : memref<16x32xf32, #tpu.memory_space<vmem>>, vector<8x4xf32>
    tpu.vector_store %arg21[%c8_28, %c0_29], %184 {strides = array<i32>} : memref<16x32xf32, #tpu.memory_space<vmem>>, vector<8x4xf32>,
    %186 = vector.extract_strided_slice %182 {offsets = [1, 0, 0], sizes = [1, 8, 4], strides = [1, 1, 1]} : vector<8x8x4xf32> to vector<1x8x4xf32>
    %187 = vector.shape_cast %186 : vector<1x8x4xf32> to vector<8x4xf32>
    %c8_30 = arith.constant 8 : index
    %c4_31 = arith.constant 4 : index
    %188 = vector.load %arg21[%c8_30, %c4_31] : memref<16x32xf32, #tpu.memory_space<vmem>>, vector<8x4xf32>
    tpu.vector_store %arg21[%c8_30, %c4_31], %187 {strides = array<i32>} : memref<16x32xf32, #tpu.memory_space<vmem>>, vector<8x4xf32>,
    %189 = vector.extract_strided_slice %182 {offsets = [2, 0, 0], sizes = [1, 8, 4], strides = [1, 1, 1]} : vector<8x8x4xf32> to vector<1x8x4xf32>
    %190 = vector.shape_cast %189 : vector<1x8x4xf32> to vector<8x4xf32>
    %c8_32 = arith.constant 8 : index
    %c8_33 = arith.constant 8 : index
    %191 = vector.load %arg21[%c8_32, %c8_33] : memref<16x32xf32, #tpu.memory_space<vmem>>, vector<8x4xf32>
    tpu.vector_store %arg21[%c8_32, %c8_33], %190 {strides = array<i32>} : memref<16x32xf32, #tpu.memory_space<vmem>>, vector<8x4xf32>,
    %192 = vector.extract_strided_slice %182 {offsets = [3, 0, 0], sizes = [1, 8, 4], strides = [1, 1, 1]} : vector<8x8x4xf32> to vector<1x8x4xf32>
    %193 = vector.shape_cast %192 : vector<1x8x4xf32> to vector<8x4xf32>
    %c8_34 = arith.constant 8 : index
    %c12_35 = arith.constant 12 : index
    %194 = vector.load %arg21[%c8_34, %c12_35] : memref<16x32xf32, #tpu.memory_space<vmem>>, vector<8x4xf32>
    tpu.vector_store %arg21[%c8_34, %c12_35], %193 {strides = array<i32>} : memref<16x32xf32, #tpu.memory_space<vmem>>, vector<8x4xf32>,
    %195 = vector.extract_strided_slice %182 {offsets = [4, 0, 0], sizes = [1, 8, 4], strides = [1, 1, 1]} : vector<8x8x4xf32> to vector<1x8x4xf32>
    %196 = vector.shape_cast %195 : vector<1x8x4xf32> to vector<8x4xf32>
    %c8_36 = arith.constant 8 : index
    %c16_37 = arith.constant 16 : index
    %197 = vector.load %arg21[%c8_36, %c16_37] : memref<16x32xf32, #tpu.memory_space<vmem>>, vector<8x4xf32>
    tpu.vector_store %arg21[%c8_36, %c16_37], %196 {strides = array<i32>} : memref<16x32xf32, #tpu.memory_space<vmem>>, vector<8x4xf32>,
    %198 = vector.extract_strided_slice %182 {offsets = [5, 0, 0], sizes = [1, 8, 4], strides = [1, 1, 1]} : vector<8x8x4xf32> to vector<1x8x4xf32>
    %199 = vector.shape_cast %198 : vector<1x8x4xf32> to vector<8x4xf32>
    %c8_38 = arith.constant 8 : index
    %c20_39 = arith.constant 20 : index
    %200 = vector.load %arg21[%c8_38, %c20_39] : memref<16x32xf32, #tpu.memory_space<vmem>>, vector<8x4xf32>
    tpu.vector_store %arg21[%c8_38, %c20_39], %199 {strides = array<i32>} : memref<16x32xf32, #tpu.memory_space<vmem>>, vector<8x4xf32>,
    %201 = vector.extract_strided_slice %182 {offsets = [6, 0, 0], sizes = [1, 8, 4], strides = [1, 1, 1]} : vector<8x8x4xf32> to vector<1x8x4xf32>
    %202 = vector.shape_cast %201 : vector<1x8x4xf32> to vector<8x4xf32>
    %c8_40 = arith.constant 8 : index
    %c24_41 = arith.constant 24 : index
    %203 = vector.load %arg21[%c8_40, %c24_41] : memref<16x32xf32, #tpu.memory_space<vmem>>, vector<8x4xf32>
    tpu.vector_store %arg21[%c8_40, %c24_41], %202 {strides = array<i32>} : memref<16x32xf32, #tpu.memory_space<vmem>>, vector<8x4xf32>,
    %204 = vector.extract_strided_slice %182 {offsets = [7, 0, 0], sizes = [1, 8, 4], strides = [1, 1, 1]} : vector<8x8x4xf32> to vector<1x8x4xf32>
    %205 = vector.shape_cast %204 : vector<1x8x4xf32> to vector<8x4xf32>
    %c8_42 = arith.constant 8 : index
    %c28_43 = arith.constant 28 : index
    %206 = vector.load %arg21[%c8_42, %c28_43] : memref<16x32xf32, #tpu.memory_space<vmem>>, vector<8x4xf32>
    tpu.vector_store %arg21[%c8_42, %c28_43], %205 {strides = array<i32>} : memref<16x32xf32, #tpu.memory_space<vmem>>, vector<8x4xf32>,
    %c0_44 = arith.constant 0 : index
    %c0_45 = arith.constant 0 : index
    %207 = vector.load %arg21[%c0_44, %c0_45] : memref<16x32xf32, #tpu.memory_space<vmem>>, vector<16x32xf32>
    %208 = arith.truncf %207 : vector<16x32xf32> to vector<16x32xbf16>
    %c0_46 = arith.constant 0 : index
    %c0_47 = arith.constant 0 : index
    %c0_48 = arith.constant 0 : index
    %209 = vector.load %arg6[%c0_46, %c0_47, %c0_48] : memref<1x32x32xbf16, #tpu.memory_space<vmem>>, vector<1x32x32xbf16>
    %210 = vector.shape_cast %209 : vector<1x32x32xbf16> to vector<32x32xbf16>
    %cst_49 = arith.constant dense<0.000000e+00> : vector<16x32xf32>
    %211 = tpu.matmul %208, %210, %cst_49 {dimension_numbers = #tpu.dot_dimension_numbers<[1], [0], [0], [1], [0, 0, 1, 1], [], []>} : vector<16x32xbf16>, vector<32x32xbf16>, vector<16x32xf32> -> vector<16x32xf32>
    %c0_50 = arith.constant 0 : index
    %c0_51 = arith.constant 0 : index
    %c0_52 = arith.constant 0 : index
    %212 = vector.load %arg7[%c0_50, %c0_51, %c0_52] : memref<1x1x32xf32, #tpu.memory_space<vmem>>, vector<1x1x32xf32>
    %213 = vector.shape_cast %212 : vector<1x1x32xf32> to vector<1x32xf32>
    %214 = vector.broadcast %213 : vector<1x32xf32> to vector<16x32xf32>
    %215 = arith.addf %211, %214 : vector<16x32xf32>
    %216 = arith.addf %3, %215 : vector<16x32xf32>
    %c0_53 = arith.constant 0 : index
    %c0_54 = arith.constant 0 : index
    %c0_55 = arith.constant 0 : index
    %217 = vector.load %arg8[%c0_53, %c0_54, %c0_55] : memref<1x1x32xf32, #tpu.memory_space<vmem>>, vector<1x1x32xf32>
    %218 = vector.shape_cast %217 : vector<1x1x32xf32> to vector<1x32xf32>
    %c0_56 = arith.constant 0 : index
    %c0_57 = arith.constant 0 : index
    %c0_58 = arith.constant 0 : index
    %219 = vector.load %arg9[%c0_56, %c0_57, %c0_58] : memref<1x1x32xf32, #tpu.memory_space<vmem>>, vector<1x1x32xf32>
    %220 = vector.shape_cast %219 : vector<1x1x32xf32> to vector<1x32xf32>
    %cst_59 = arith.constant dense<0.000000e+00> : vector<16xf32>
    %221 = vector.multi_reduction <add>, %216, %cst_59 [1] : vector<16x32xf32> to vector<16xf32>
    %222 = vector.shape_cast %221 : vector<16xf32> to vector<16x1xf32>
    %cst_60 = arith.constant 3.200000e+01 : f32
    %223 = vector.broadcast %cst_60 : f32 to vector<16x1xf32>
    %224 = arith.divf %222, %223 : vector<16x1xf32>
    %225 = vector.broadcast %224 : vector<16x1xf32> to vector<16x32xf32>
    %226 = arith.subf %216, %225 : vector<16x32xf32>
    %227 = arith.mulf %226, %226 : vector<16x32xf32>
    %cst_61 = arith.constant dense<0.000000e+00> : vector<16xf32>
    %228 = vector.multi_reduction <add>, %227, %cst_61 [1] : vector<16x32xf32> to vector<16xf32>
    %229 = vector.shape_cast %228 : vector<16xf32> to vector<16x1xf32>
    %cst_62 = arith.constant 3.200000e+01 : f32
    %230 = vector.broadcast %cst_62 : f32 to vector<16x1xf32>
    %231 = arith.divf %229, %230 : vector<16x1xf32>
    %232 = vector.broadcast %224 : vector<16x1xf32> to vector<16x32xf32>
    %233 = arith.subf %216, %232 : vector<16x32xf32>
    %cst_63 = arith.constant 9.99999974E-6 : f32
    %234 = vector.broadcast %cst_63 : f32 to vector<16x1xf32>
    %235 = arith.addf %231, %234 : vector<16x1xf32>
    %236 = math.rsqrt %235 : vector<16x1xf32>
    %237 = vector.broadcast %236 : vector<16x1xf32> to vector<16x32xf32>
    %238 = arith.mulf %233, %237 : vector<16x32xf32>
    %239 = vector.broadcast %218 : vector<1x32xf32> to vector<16x32xf32>
    %240 = arith.mulf %238, %239 : vector<16x32xf32>
    %241 = vector.broadcast %220 : vector<1x32xf32> to vector<16x32xf32>
    %242 = arith.addf %240, %241 : vector<16x32xf32>
    %243 = arith.truncf %242 : vector<16x32xf32> to vector<16x32xbf16>
    %c0_64 = arith.constant 0 : index
    %c0_65 = arith.constant 0 : index
    %c0_66 = arith.constant 0 : index
    %244 = vector.load %arg12[%c0_64, %c0_65, %c0_66] : memref<1x32x128xbf16, #tpu.memory_space<vmem>>, vector<1x32x128xbf16>
    %245 = vector.shape_cast %244 : vector<1x32x128xbf16> to vector<32x128xbf16>
    %cst_67 = arith.constant dense<0.000000e+00> : vector<16x128xf32>
    %246 = tpu.matmul %243, %245, %cst_67 {dimension_numbers = #tpu.dot_dimension_numbers<[1], [0], [0], [1], [0, 0, 1, 1], [], []>} : vector<16x32xbf16>, vector<32x128xbf16>, vector<16x128xf32> -> vector<16x128xf32>
    %c0_68 = arith.constant 0 : index
    %c0_69 = arith.constant 0 : index
    %c0_70 = arith.constant 0 : index
    %247 = vector.load %arg13[%c0_68, %c0_69, %c0_70] : memref<1x1x128xf32, #tpu.memory_space<vmem>>, vector<1x1x128xf32>
    %248 = vector.shape_cast %247 : vector<1x1x128xf32> to vector<1x128xf32>
    %249 = vector.broadcast %248 : vector<1x128xf32> to vector<16x128xf32>
    %250 = arith.addf %246, %249 : vector<16x128xf32>
    %cst_71 = arith.constant 0.000000e+00 : f32
    %251 = vector.broadcast %cst_71 : f32 to vector<16x128xf32>
    %252 = arith.maximumf %250, %251 : vector<16x128xf32>
    %253 = arith.truncf %252 : vector<16x128xf32> to vector<16x128xbf16>
    %c0_72 = arith.constant 0 : index
    %c0_73 = arith.constant 0 : index
    %c0_74 = arith.constant 0 : index
    %254 = vector.load %arg14[%c0_72, %c0_73, %c0_74] : memref<1x128x32xbf16, #tpu.memory_space<vmem>>, vector<1x128x32xbf16>
    %255 = vector.shape_cast %254 : vector<1x128x32xbf16> to vector<128x32xbf16>
    %cst_75 = arith.constant dense<0.000000e+00> : vector<16x32xf32>
    %256 = tpu.matmul %253, %255, %cst_75 {dimension_numbers = #tpu.dot_dimension_numbers<[1], [0], [0], [1], [0, 0, 1, 1], [], []>} : vector<16x128xbf16>, vector<128x32xbf16>, vector<16x32xf32> -> vector<16x32xf32>
    %c0_76 = arith.constant 0 : index
    %c0_77 = arith.constant 0 : index
    %c0_78 = arith.constant 0 : index
    %257 = vector.load %arg15[%c0_76, %c0_77, %c0_78] : memref<1x1x32xf32, #tpu.memory_space<vmem>>, vector<1x1x32xf32>
    %258 = vector.shape_cast %257 : vector<1x1x32xf32> to vector<1x32xf32>
    %259 = vector.broadcast %258 : vector<1x32xf32> to vector<16x32xf32>
    %260 = arith.addf %256, %259 : vector<16x32xf32>
    %261 = arith.addf %242, %260 : vector<16x32xf32>
    %c0_79 = arith.constant 0 : index
    %c0_80 = arith.constant 0 : index
    %c0_81 = arith.constant 0 : index
    %262 = vector.load %arg10[%c0_79, %c0_80, %c0_81] : memref<1x1x32xf32, #tpu.memory_space<vmem>>, vector<1x1x32xf32>
    %263 = vector.shape_cast %262 : vector<1x1x32xf32> to vector<1x32xf32>
    %c0_82 = arith.constant 0 : index
    %c0_83 = arith.constant 0 : index
    %c0_84 = arith.constant 0 : index
    %264 = vector.load %arg11[%c0_82, %c0_83, %c0_84] : memref<1x1x32xf32, #tpu.memory_space<vmem>>, vector<1x1x32xf32>
    %265 = vector.shape_cast %264 : vector<1x1x32xf32> to vector<1x32xf32>
    %cst_85 = arith.constant dense<0.000000e+00> : vector<16xf32>
    %266 = vector.multi_reduction <add>, %261, %cst_85 [1] : vector<16x32xf32> to vector<16xf32>
    %267 = vector.shape_cast %266 : vector<16xf32> to vector<16x1xf32>
    %cst_86 = arith.constant 3.200000e+01 : f32
    %268 = vector.broadcast %cst_86 : f32 to vector<16x1xf32>
    %269 = arith.divf %267, %268 : vector<16x1xf32>
    %270 = vector.broadcast %269 : vector<16x1xf32> to vector<16x32xf32>
    %271 = arith.subf %261, %270 : vector<16x32xf32>
    %272 = arith.mulf %271, %271 : vector<16x32xf32>
    %cst_87 = arith.constant dense<0.000000e+00> : vector<16xf32>
    %273 = vector.multi_reduction <add>, %272, %cst_87 [1] : vector<16x32xf32> to vector<16xf32>
    %274 = vector.shape_cast %273 : vector<16xf32> to vector<16x1xf32>
    %cst_88 = arith.constant 3.200000e+01 : f32
    %275 = vector.broadcast %cst_88 : f32 to vector<16x1xf32>
    %276 = arith.divf %274, %275 : vector<16x1xf32>
    %277 = vector.broadcast %269 : vector<16x1xf32> to vector<16x32xf32>
    %278 = arith.subf %261, %277 : vector<16x32xf32>
    %cst_89 = arith.constant 9.99999974E-6 : f32
    %279 = vector.broadcast %cst_89 : f32 to vector<16x1xf32>
    %280 = arith.addf %276, %279 : vector<16x1xf32>
    %281 = math.rsqrt %280 : vector<16x1xf32>
    %282 = vector.broadcast %281 : vector<16x1xf32> to vector<16x32xf32>
    %283 = arith.mulf %278, %282 : vector<16x32xf32>
    %284 = vector.broadcast %263 : vector<1x32xf32> to vector<16x32xf32>
    %285 = arith.mulf %283, %284 : vector<16x32xf32>
    %286 = vector.broadcast %265 : vector<1x32xf32> to vector<16x32xf32>
    %287 = arith.addf %285, %286 : vector<16x32xf32>
    %c0_90 = arith.constant 0 : index
    %c0_91 = arith.constant 0 : index
    %288 = vector.load %arg20[%c0_90, %c0_91] : memref<16x32xf32, #tpu.memory_space<vmem>>, vector<16x32xf32>
    tpu.vector_store %arg20[%c0_90, %c0_91], %287 {strides = array<i32>} : memref<16x32xf32, #tpu.memory_space<vmem>>, vector<16x32xf32>,
    %c1_i32 = arith.constant 1 : i32
    %289 = arith.cmpi eq, %arg1, %c1_i32 : i32
    %290 = arith.extui %289 : i1 to i32
    %c0_i32_92 = arith.constant 0 : i32
    %291 = arith.cmpi ne, %290, %c0_i32_92 : i32
    scf.if %291 {
      %c0_93 = arith.constant 0 : index
      %c0_94 = arith.constant 0 : index
      %292 = vector.load %arg16[%c0_93, %c0_94] : memref<2x32xf32, #tpu.memory_space<vmem>>, vector<2x32xf32>
      %c0_95 = arith.constant 0 : index
      %c0_96 = arith.constant 0 : index
      %293 = vector.load %arg17[%c0_95, %c0_96] : memref<2x1xf32, #tpu.memory_space<vmem>>, vector<2x1xf32>
      %294 = vector.extract_strided_slice %287 {offsets = [0, 0], sizes = [8, 32], strides = [1, 1]} : vector<16x32xf32> to vector<8x32xf32>
      "tpu.trace_start"() <{level = 10 : i32, message = "od,sd->os"}> : () -> ()
      %cst_97 = arith.constant dense<0.000000e+00> : vector<2x8xf32>
      %295 = tpu.matmul %292, %294, %cst_97 {dimension_numbers = #tpu.dot_dimension_numbers<[1], [1], [0], [0], [0, 0, 1, 0], [], []>} : vector<2x32xf32>, vector<8x32xf32>, vector<2x8xf32> -> vector<2x8xf32>
      "tpu.trace_stop"() : () -> ()
      %296 = vector.broadcast %293 : vector<2x1xf32> to vector<2x8xf32>
      %297 = arith.addf %295, %296 : vector<2x8xf32>
      %298 = vector.extract_strided_slice %297 {offsets = [0, 0], sizes = [1, 8], strides = [1, 1]} : vector<2x8xf32> to vector<1x8xf32>
      %c0_98 = arith.constant 0 : index
      %c0_99 = arith.constant 0 : index
      %c0_100 = arith.constant 0 : index
      %299 = vector.load %arg18[%c0_98, %c0_99, %c0_100] : memref<2x1x8xf32, #tpu.memory_space<vmem>>, vector<1x1x8xf32>
      %300 = vector.shape_cast %299 : vector<1x1x8xf32> to vector<1x8xf32>
      %301 = vector.shape_cast %298 : vector<1x8xf32> to vector<1x1x8xf32>
      tpu.vector_store %arg18[%c0_98, %c0_99, %c0_100], %301 {strides = array<i32>} : memref<2x1x8xf32, #tpu.memory_space<vmem>>, vector<1x1x8xf32>,
      %302 = vector.extract_strided_slice %297 {offsets = [1, 0], sizes = [1, 8], strides = [1, 1]} : vector<2x8xf32> to vector<1x8xf32>
      %c0_101 = arith.constant 0 : index
      %c0_102 = arith.constant 0 : index
      %c0_103 = arith.constant 0 : index
      %303 = vector.load %arg19[%c0_101, %c0_102, %c0_103] : memref<2x1x8xf32, #tpu.memory_space<vmem>>, vector<1x1x8xf32>
      %304 = vector.shape_cast %303 : vector<1x1x8xf32> to vector<1x8xf32>
      %305 = vector.shape_cast %302 : vector<1x8xf32> to vector<1x1x8xf32>
      tpu.vector_store %arg19[%c0_101, %c0_102, %c0_103], %305 {strides = array<i32>} : memref<2x1x8xf32, #tpu.memory_space<vmem>>, vector<1x1x8xf32>,
      %306 = vector.extract_strided_slice %287 {offsets = [8, 0], sizes = [8, 32], strides = [1, 1]} : vector<16x32xf32> to vector<8x32xf32>
      "tpu.trace_start"() <{level = 10 : i32, message = "od,sd->os"}> : () -> ()
      %cst_104 = arith.constant dense<0.000000e+00> : vector<2x8xf32>
      %307 = tpu.matmul %292, %306, %cst_104 {dimension_numbers = #tpu.dot_dimension_numbers<[1], [1], [0], [0], [0, 0, 1, 0], [], []>} : vector<2x32xf32>, vector<8x32xf32>, vector<2x8xf32> -> vector<2x8xf32>
      "tpu.trace_stop"() : () -> ()
      %308 = vector.broadcast %293 : vector<2x1xf32> to vector<2x8xf32>
      %309 = arith.addf %307, %308 : vector<2x8xf32>
      %310 = vector.extract_strided_slice %309 {offsets = [0, 0], sizes = [1, 8], strides = [1, 1]} : vector<2x8xf32> to vector<1x8xf32>
      %c1 = arith.constant 1 : index
      %c0_105 = arith.constant 0 : index
      %c0_106 = arith.constant 0 : index
      %311 = vector.load %arg18[%c1, %c0_105, %c0_106] : memref<2x1x8xf32, #tpu.memory_space<vmem>>, vector<1x1x8xf32>
      %312 = vector.shape_cast %311 : vector<1x1x8xf32> to vector<1x8xf32>
      %313 = vector.shape_cast %310 : vector<1x8xf32> to vector<1x1x8xf32>
      tpu.vector_store %arg18[%c1, %c0_105, %c0_106], %313 {strides = array<i32>} : memref<2x1x8xf32, #tpu.memory_space<vmem>>, vector<1x1x8xf32>,
      %314 = vector.extract_strided_slice %309 {offsets = [1, 0], sizes = [1, 8], strides = [1, 1]} : vector<2x8xf32> to vector<1x8xf32>
      %c1_107 = arith.constant 1 : index
      %c0_108 = arith.constant 0 : index
      %c0_109 = arith.constant 0 : index
      %315 = vector.load %arg19[%c1_107, %c0_108, %c0_109] : memref<2x1x8xf32, #tpu.memory_space<vmem>>, vector<1x1x8xf32>
      %316 = vector.shape_cast %315 : vector<1x1x8xf32> to vector<1x8xf32>
      %317 = vector.shape_cast %314 : vector<1x8xf32> to vector<1x1x8xf32>
      tpu.vector_store %arg19[%c1_107, %c0_108, %c0_109], %317 {strides = array<i32>} : memref<2x1x8xf32, #tpu.memory_space<vmem>>, vector<1x1x8xf32>,
    } else {
    }
    return
  }
  func.func @transform_0(%arg0: i32, %arg1: i32) -> (i32, i32, i32) {
    %c0_i32 = arith.constant 0 : i32
    %c0_i32_0 = arith.constant 0 : i32
    %c0_i32_1 = arith.constant 0 : i32
    return %arg0, %c0_i32, %c0_i32_0 : i32, i32, i32
  }
  func.func @transform_1(%arg0: i32, %arg1: i32) -> (i32, i32) {
    %c0_i32 = arith.constant 0 : i32
    %c0_i32_0 = arith.constant 0 : i32
    return %arg0, %c0_i32 : i32, i32
  }
  func.func @transform_2(%arg0: i32, %arg1: i32) -> (i32, i32, i32) {
    %c0_i32 = arith.constant 0 : i32
    %c0_i32_0 = arith.constant 0 : i32
    %c0_i32_1 = arith.constant 0 : i32
    return %arg1, %c0_i32, %c0_i32_0 : i32, i32, i32
  }
  func.func @transform_3(%arg0: i32, %arg1: i32) -> (i32, i32, i32) {
    %c0_i32 = arith.constant 0 : i32
    %c0_i32_0 = arith.constant 0 : i32
    %c0_i32_1 = arith.constant 0 : i32
    return %arg1, %c0_i32, %c0_i32_0 : i32, i32, i32
  }
  func.func @transform_4(%arg0: i32, %arg1: i32) -> (i32, i32, i32) {
    %c0_i32 = arith.constant 0 : i32
    %c0_i32_0 = arith.constant 0 : i32
    %c0_i32_1 = arith.constant 0 : i32
    return %arg1, %c0_i32, %c0_i32_0 : i32, i32, i32
  }
  func.func @transform_5(%arg0: i32, %arg1: i32) -> (i32, i32, i32) {
    %c0_i32 = arith.constant 0 : i32
    %c0_i32_0 = arith.constant 0 : i32
    %c0_i32_1 = arith.constant 0 : i32
    return %arg1, %c0_i32, %c0_i32_0 : i32, i32, i32
  }
  func.func @transform_6(%arg0: i32, %arg1: i32) -> (i32, i32, i32) {
    %c0_i32 = arith.constant 0 : i32
    %c0_i32_0 = arith.constant 0 : i32
    %c0_i32_1 = arith.constant 0 : i32
    return %arg1, %c0_i32, %c0_i32_0 : i32, i32, i32
  }
  func.func @transform_7(%arg0: i32, %arg1: i32) -> (i32, i32, i32) {
    %c0_i32 = arith.constant 0 : i32
    %c0_i32_0 = arith.constant 0 : i32
    %c0_i32_1 = arith.constant 0 : i32
    return %arg1, %c0_i32, %c0_i32_0 : i32, i32, i32
  }
  func.func @transform_8(%arg0: i32, %arg1: i32) -> (i32, i32, i32) {
    %c0_i32 = arith.constant 0 : i32
    %c0_i32_0 = arith.constant 0 : i32
    %c0_i32_1 = arith.constant 0 : i32
    return %arg1, %c0_i32, %c0_i32_0 : i32, i32, i32
  }
  func.func @transform_9(%arg0: i32, %arg1: i32) -> (i32, i32, i32) {
    %c0_i32 = arith.constant 0 : i32
    %c0_i32_0 = arith.constant 0 : i32
    %c0_i32_1 = arith.constant 0 : i32
    return %arg1, %c0_i32, %c0_i32_0 : i32, i32, i32
  }
  func.func @transform_10(%arg0: i32, %arg1: i32) -> (i32, i32, i32) {
    %c0_i32 = arith.constant 0 : i32
    %c0_i32_0 = arith.constant 0 : i32
    %c0_i32_1 = arith.constant 0 : i32
    return %arg1, %c0_i32, %c0_i32_0 : i32, i32, i32
  }
  func.func @transform_11(%arg0: i32, %arg1: i32) -> (i32, i32, i32) {
    %c0_i32 = arith.constant 0 : i32
    %c0_i32_0 = arith.constant 0 : i32
    %c0_i32_1 = arith.constant 0 : i32
    return %arg1, %c0_i32, %c0_i32_0 : i32, i32, i32
  }
  func.func @transform_12(%arg0: i32, %arg1: i32) -> (i32, i32, i32) {
    %c0_i32 = arith.constant 0 : i32
    %c0_i32_0 = arith.constant 0 : i32
    %c0_i32_1 = arith.constant 0 : i32
    return %arg1, %c0_i32, %c0_i32_0 : i32, i32, i32
  }
  func.func @transform_13(%arg0: i32, %arg1: i32) -> (i32, i32, i32) {
    %c0_i32 = arith.constant 0 : i32
    %c0_i32_0 = arith.constant 0 : i32
    %c0_i32_1 = arith.constant 0 : i32
    return %arg1, %c0_i32, %c0_i32_0 : i32, i32, i32
  }
  func.func @transform_14(%arg0: i32, %arg1: i32) -> (i32, i32) {
    %c0_i32 = arith.constant 0 : i32
    %c0_i32_0 = arith.constant 0 : i32
    %c0_i32_1 = arith.constant 0 : i32
    return %c0_i32, %c0_i32_0 : i32, i32
  }
  func.func @transform_15(%arg0: i32, %arg1: i32) -> (i32, i32) {
    %c0_i32 = arith.constant 0 : i32
    %c0_i32_0 = arith.constant 0 : i32
    %c0_i32_1 = arith.constant 0 : i32
    return %c0_i32, %c0_i32_0 : i32, i32
  }
  func.func @transform_16(%arg0: i32, %arg1: i32) -> (i32, i32, i32) {
    %c0_i32 = arith.constant 0 : i32
    %c0_i32_0 = arith.constant 0 : i32
    %c0_i32_1 = arith.constant 0 : i32
    return %arg0, %c0_i32, %c0_i32_0 : i32, i32, i32
  }
  func.func @transform_17(%arg0: i32, %arg1: i32) -> (i32, i32, i32) {
    %c0_i32 = arith.constant 0 : i32
    %c0_i32_0 = arith.constant 0 : i32
    %c0_i32_1 = arith.constant 0 : i32
    return %arg0, %c0_i32, %c0_i32_0 : i32, i32, i32
  }
}

</mosaic_0001>

<bundles_post_ra>
// kernel: transformer_model_forward.1
= control target key start
LH: loop header
LB: loop body
LE: loop exit
PB: predicated region body
PF: predicated region fallthrough
CT: control target
= control target key end

     0   :  { %s4979_s0 = inlined_call_operand.vmem [shape: f32[2,1,8], index: 0, kind: input, shape index: {}]   ;;  %s4980_s1 = inlined_call_operand.vmem [shape: f32[16,32], index: 1, kind: input, shape index: {}]   ;;  %s4981_s2 = inlined_call_operand.vmem [shape: bf16[2,32,96], index: 2, kind: input, shape index: {}]   ;;  %s4982_s3 = inlined_call_operand.vmem [shape: f32[2,1,96], index: 3, kind: input, shape index: {}]   ;;  %s4983_s4 = inlined_call_operand.vmem [shape: bf16[2,32,32], index: 4, kind: input, shape index: {}]   ;;  %s4984_s5 = inlined_call_operand.vmem [shape: f32[2,1,32], index: 5, kind: input, shape index: {}]   ;;  %s4985_s6 = inlined_call_operand.vmem [shape: f32[2,1,32], index: 6, kind: input, shape index: {}]   ;;  %s4986_s7 = inlined_call_operand.vmem [shape: f32[2,1,32], index: 7, kind: input, shape index: {}]   ;;  %s4987_s8 = inlined_call_operand.vmem [shape: f32[2,1,32], index: 8, kind: input, shape index: {}]   ;;  %s4988_s9 = inlined_call_operand.vmem [shape: f32[2,1,32], index: 9, kind: input, shape index: {}]   ;;  %s4989_s10 = inlined_call_operand.vmem [shape: bf16[2,32,128], index: 10, kind: input, shape index: {}]   ;;  %s4990_s11 = inlined_call_operand.vmem [shape: f32[2,1,128], index: 11, kind: input, shape index: {}]   ;;  %s4991_s12 = inlined_call_operand.vmem [shape: bf16[2,128,32], index: 12, kind: input, shape index: {}]   ;;  %s4992_s13 = inlined_call_operand.vmem [shape: f32[2,1,32], index: 13, kind: input, shape index: {}]   ;;  %s4993_s14 = inlined_call_operand.vmem [shape: f32[2,32], index: 14, kind: input, shape index: {}]   ;;  %s4994_s15 = inlined_call_operand.vmem [shape: f32[2,1], index: 15, kind: input, shape index: {}]   ;;  %s4995_s16 = inlined_call_operand.hbm [shape: f32[2,1,8], index: 16, kind: output, shape index: {0}]   ;;  %s4996_s17 = inlined_call_operand.hbm [shape: f32[2,1,8], index: 17, kind: output, shape index: {1}]  }
   0x1   :  { %5004 = sst [smem:[#allocation14_spill]] %s4979_s0 }
   0x2   :  { %5005 = sst [smem:[#allocation15_spill]] %s4980_s1 }
   0x3   :  { %5006 = sst [smem:[#allocation16_spill]] %s4981_s2 }
   0x4   :  { %5007 = sst [smem:[#allocation17_spill]] %s4983_s4 }
   0x5   :  { %5008 = sst [smem:[#allocation18_spill]] %s4993_s14 }
   0x6   :  { %5009 = sst [smem:[#allocation19_spill]] %s4994_s15 }
   0x7   :  { %5010 = sst [smem:[#allocation20_spill]] %s4995_s16 }
   0x8   :  { %5011 = sst [smem:[#allocation21_spill]] %s4996_s17 }
   0x9   :  { %23 = vsyncpa [#allocation5], 0 }
   0xa   :  { %24 = vsyncpa [#allocation7], 0  ;;  %s4262_s24 = smov 0   ;;  %s4264_s25 = smov 0  }
   0xb   :  { %s4266_s26 = smov 0  }
   0xc LB: > { %5012 = sst [smem:[#allocation10_spill]] %s4142_s25  ;;  %s39_s28 = sadd.s32 1, %s4142_s25  ;;  %s4146_s26 = sphi %s4266_s26, %s30_s26   ;;  %s4142_s25 = sphi %s4264_s25, %s5033_s25   ;;  %s4138_s24 = sphi %s4262_s24, %s5032_s24  }
   0xd   : > { %5013 = sst [smem:[#allocation11_spill]] %s4146_s26  ;;  %p40_p0 = scmp.ge.s32.totalorder %s39_s28, 2 }
   0xe   : > { %p3499_p1 = scmp.ge.s32.totalorder %s4146_s26, 1  ;;  %p619_p2 = scmp.lt.s32.totalorder %s4146_s26, 3 }
   0xf   : > { %s5035_s28 = smov (%p40_p0, %s39_s28), 0 }
  0x10   : > { %5014 = sst [smem:[#allocation12_spill]] %s5035_s28  ;;  %p620_p3 = pnand %p3499_p1, %p619_p2 }
  0x12   : > { %623 = sbr.rel (%p620_p3) target bundleno = 3619 (0xe23), region = 84 }
  0x19   : > { %p725_p4 = scmp.lt.s32.totalorder %s4138_s24, 1  ;;  %s5015_s2 = sld [smem:[#allocation16_spill]] }
  0x1a   : > { %s5016_s4 = sld [smem:[#allocation17_spill]]  ;;  %p3508_p5 = scmp.ne.s32.totalorder %s4138_s24, 0 }
  0x1b   : > { %s4285_s29 = scalar_select %p725_p4, %s4138_s24, 1 }
  0x1c   : > { %775 = sbr.rel (%p3508_p5) target bundleno = 43 (0x2b), region = 88  ;;  %vm778_vm0 = vcmask (!%p3508_p5), 261120  }
  0x1d   : > { %s3579_s0 = sshll.u32 %s4285_s29, 4  ;;  %s740_s17 = scalar_lea.vmem %s4984_s5, %s4285_s29 }
  0x1e   : > { %s749_s20 = scalar_lea.vmem %s4987_s8, %s4285_s29  ;;  %s752_s23 = scalar_lea.vmem %s4988_s9, %s4285_s29 }
  0x1f   : > { %s729_s21 = scalar_lea.vmem %s5015_s2, %s3579_s0  ;;  %s4323_s25 = scalar_lea.vmem %s4989_s10, %s3579_s0 }
  0x20   : > { %s4298_s27 = scalar_lea.vmem %s5016_s4, %s3579_s0  ;;  %s760_s26 = scalar_lea.vmem %s4990_s11, %s4285_s29 }
  0x21   : > { %5017 = sst [smem:[#allocation13_spill]] %s4298_s27  ;;  %s3582_s15 = sshll.u32 %s4285_s29, 6 }
  0x22   : > { %s4333_s18 = scalar_lea.vmem %s4991_s12, %s3582_s15  ;;  %s768_s2 = scalar_lea.vmem %s4992_s13, %s4285_s29 }
  0x23   : > { %s5018_s0 = sld [smem:[#allocation15_spill]] }
  0x29   : > { %v776_v0 = vld [vmem:[%s5018_s0] sm:$0xff]  ;;  %v777_v1 = vld [vmem:[%s5018_s0 + $0x8] sm:$0xff] }
  0x2a   : > { %779 = vst.msk [vmem:[#allocation2] sm:$0xff] %vm778_vm0, %v776_v0  ;;  %780 = vst.msk [vmem:[#allocation2 + $0x8] sm:$0xff] %vm778_vm0, %v777_v1 }
  0x2b PF: > { %v3975_v2 = vld [vmem:[%s729_s21] sm:$0xff]   ;;  %v4148_v3 = vmov 0.0   ;;  %v3976_v4 = vld [vmem:[%s729_s21 + $0x8] sm:$0xff]   ;;  %vm4149_vm1 = vmmov 0   ;;  %vm809_vm2 = vcmask 261120   ;;  %s5019_s16 = scalar_lea.vmem %s4982_s3, %s4285_s29  ;;  %s4150_s14 = smov 116  }
  0x2c   : > { %3669 = vmatprep.subr.bf16.mxu0 %v4148_v3  ;;  %3689 = vmatprep.subr.bf16.mxu1 %v4148_v3  ;;  %v3509_v8 = vld [vmem:[%s5019_s16] ss:$0 sm:$0xff]  ;;  %s4151_s30 = smov 124   ;;  %s4152_s19 = smov 112   ;;  %vm893_vm3 = vcmask 31744   ;;  %vm1385_vm4 = vcmask 1043456  }
  0x2d   : > { %3670 = vmatpush3.bf16.msra.mxu0 %v3975_v2  ;;  %3673 = vmatprep.mubr.msk.bf16.mxu0 %vm4149_vm1, %v4148_v3  ;;  %s4153_s1 = smov 120   ;;  %s4154_s4 = smov 104   ;;  %vm1283_vm5 = vcmask 64512   ;;  %vm1770_vm6 = vcmask 64544   ;;  %vm1776_vm7 = vcmask 97344   ;;  %vm1782_vm8 = vcmask 130144  }
  0x2e   : > { %3671 = vmatprep.subr.bf16.mxu0 %v4148_v3  ;;  %3691 = vmatprep.mubr.msk.bf16.mxu1 %vm4149_vm1, %v4148_v3  ;;  %s4155_s27 = smov 108   ;;  %s4156_s22 = smov 100   ;;  %vm1788_vm9 = vcmask 162944   ;;  %vm1794_vm10 = vcmask 195744   ;;  %vm1800_vm11 = vcmask 228544   ;;  %vm1806_vm12 = vcmask 261344  }
  0x2f   : > { %s4157_s28 = smov 96   ;;  %s4158_s15 = smov 64  }
  0x30   : > { %s4165_s21 = smov 28   ;;  %s5021_s16 = sld [smem:[#allocation13_spill]] }
  0x31   : > { %v781_v5 = vld [vmem:[#allocation2] sm:$0xff]  ;;  %v782_v6 = vld [vmem:[#allocation2 + $0x8] sm:$0xff]  ;;  %3672 = vmatpush3.bf16.msra.mxu0 %v3976_v4  ;;  %p3568_p6 = scmp.ne.s32.totalorder %s4138_s24, 1 }
  0x32   : > { %v783_v7 = vpack.c.bf16 %v782_v6, %v781_v5  ;;  %3677 = vmatprep.subr.bf16.mxu0 %v4148_v3  ;;  %vm4167_vm13 = vmmov (!%p3568_p6), 0   ;;  %vm3187_vm14 = vcmask (!%p3568_p6), 57344   ;;  %vm3189_vm15 = vcmask (!%p3568_p6), 58369  }
  0x34   : > { %3674 = vmatmul.mubr.msk.bf16.vlgmr.msra.gmra.mrb[0].mxu0 %vm809_vm2, %v783_v7 }
  0x35   : > { %3679 = vmatprep.mubr.msk.bf16.mxu0 %vm4149_vm1, %v4148_v3 }
 0x107   : > { %v847_v9 = vpop.f32.mrb[0].mxu0 }
 0x108   : > { %v848_v10 = vadd.f32 %v3509_v8, %v847_v9  ;;  %v3675_v11 = vpop.f32.mrb[1].mxu0 }
 0x109   : > { %v850_v12 = vpop.f32.mrb[2].mxu0 }
 0x10a   : > { %v4362_v13 = vadd.f32 %v3509_v8, %v850_v12  ;;  %861 = vrot.lane.b32.xlu1 %v848_v10, %s4150_s14  ;;  %855 = vrot.lane.b32.xlu0 %v848_v10, %s4151_s30  ;;  %v3676_v14 = vpop.f32.mrb[3].mxu0  ;;  %v876_v15 = vpack.c.bf16 %v848_v10, %v848_v10 }
 0x10e   : > { %864 = vrot.lane.b32.xlu1 %v848_v10, %s4152_s19  ;;  %858 = vrot.lane.b32.xlu0 %v848_v10, %s4153_s1 }
 0x112   : > { %870 = vrot.lane.b32.xlu1 %v848_v10, %s4154_s4  ;;  %867 = vrot.lane.b32.xlu0 %v848_v10, %s4155_s27 }
 0x116   : > { %873 = vrot.lane.b32.xlu0 %v848_v10, %s4156_s22  ;;  %891 = vrot.lane.b32.xlu1 %v876_v15, %s4157_s28 }
 0x17c   : > { %v862_v16 = vpop.permute.xlu1 %861  ;;  %v856_v17 = vpop.permute.xlu0 %855 }
 0x17d   : > { %v877_v18 = vpack.c.bf16 %v856_v17, %v856_v17  ;;  %v879_v21 = vpack.c.bf16 %v862_v16, %v862_v16 }
 0x17f   : > { %941 = vrot.lane.b32.xlu0 %v877_v18, %s4157_s28 }
 0x180   : > { %v865_v19 = vpop.permute.xlu1 %864  ;;  %v859_v20 = vpop.permute.xlu0 %858 }
 0x181   : > { %v878_v22 = vpack.c.bf16 %v859_v20, %v859_v20  ;;  %v4375_v25 = vpack.c.bf16 %v865_v19, %v865_v19 }
 0x183   : > { %1039 = vrot.lane.b32.xlu0 %v879_v21, %s4157_s28  ;;  %990 = vrot.lane.b32.xlu1 %v878_v22, %s4157_s28 }
 0x184   : > { %v871_v23 = vpop.permute.xlu1 %870  ;;  %v868_v24 = vpop.permute.xlu0 %867 }
 0x185   : > { %v4377_v26 = vpack.c.bf16 %v868_v24, %v868_v24  ;;  %v4383_v29 = vpack.c.bf16 %v871_v23, %v871_v23 }
 0x187   : > { %1137 = vrot.lane.b32.xlu0 %v4377_v26, %s4157_s28  ;;  %1088 = vrot.lane.b32.xlu1 %v4375_v25, %s4157_s28 }
 0x188   : > { %v874_v27 = vpop.permute.xlu0 %873  ;;  %v892_v28 = vpop.permute.xlu1 %891 }
 0x189   : > { %v4385_v30 = vpack.c.bf16 %v874_v27, %v874_v27  ;;  %v898_v31 = vsel %vm893_vm3, %v892_v28, 0 }
 0x18a   : > { %3678 = vmatpush3.bf16.xpose.msra.mxu0 %v898_v31 }
 0x18b   : > { %1235 = vrot.lane.b32.xlu0 %v4385_v30, %s4157_s28  ;;  %1186 = vrot.lane.b32.xlu1 %v4383_v29, %s4157_s28 }
 0x18c   : > { %3683 = vmatprep.subr.bf16.mxu0 %v4148_v3 }
 0x18f   : > { %1812 = vrot.lane.b32.xlu1 %v4362_v13, %s4153_s1  ;;  %1809 = vrot.lane.b32.xlu0 %v4362_v13, %s4151_s30  ;;  %s4159_s1 = smov 4  }
 0x191   : > { %3680 = vmatmul.mubr.msk.bf16.vlgmr.msra.gmra.mrb[4].mxu0 %vm893_vm3, %v876_v15 }
 0x192   : > { %3685 = vmatprep.mubr.msk.bf16.mxu0 %vm4149_vm1, %v4148_v3 }
 0x193   : > { %1821 = vrot.lane.b32.xlu1 %v4362_v13, %s4155_s27  ;;  %1815 = vrot.lane.b32.xlu0 %v4362_v13, %s4150_s14  ;;  %s5020_s14 = sld [smem:[#allocation14_spill]]  ;;  %s4161_s27 = smov 12  }
 0x197   : > { %1827 = vrot.lane.b32.xlu1 %v4362_v13, %s4156_s22  ;;  %1818 = vrot.lane.b32.xlu0 %v4362_v13, %s4152_s19  ;;  %s4162_s22 = smov 16  }
 0x199   : > { %v3513_v57 = vld [vmem:[%s5020_s14] ss:$0 sm:$0xff] }
 0x19b   : > { %1429 = vrot.lane.b32.xlu1 %v877_v18, %s4158_s15  ;;  %1824 = vrot.lane.b32.xlu0 %v4362_v13, %s4154_s4  ;;  %s4160_s4 = smov 8  }
 0x19f   : > { %1525 = vrot.lane.b32.xlu1 %v879_v21, %s4158_s15  ;;  %1380 = vrot.lane.b32.xlu0 %v876_v15, %s4158_s15 }
 0x1a3   : > { %1477 = vrot.lane.b32.xlu0 %v878_v22, %s4158_s15 }
 0x1f1   : > { %v942_v32 = vpop.permute.xlu0 %941 }
 0x1f2   : > { %v947_v33 = vsel %vm893_vm3, %v942_v32, 0 }
 0x1f3   : > { %3684 = vmatpush3.bf16.xpose.msra.mxu0 %v947_v33 }
 0x1f4   : > { %3695 = vmatprep.subr.bf16.mxu0 %v4148_v3 }
 0x1f5   : > { %v1040_v34 = vpop.permute.xlu0 %1039  ;;  %v991_v35 = vpop.permute.xlu1 %990 }
 0x1f6   : > { %v996_v36 = vsel %vm893_vm3, %v991_v35, 0  ;;  %v1045_v39 = vsel %vm893_vm3, %v1040_v34, 0 }
 0x1f7   : > { %3690 = vmatpush3.bf16.xpose.msra.mxu1 %v996_v36 }
 0x1f8   : > { %3701 = vmatprep.subr.bf16.mxu1 %v4148_v3 }
 0x1f9   : > { %v1138_v37 = vpop.permute.xlu0 %1137  ;;  %v1089_v38 = vpop.permute.xlu1 %1088 }
 0x1fa   : > { %3686 = vmatmul.mubr.msk.bf16.vlgmr.msra.gmra.mrb[8].mxu0 %vm893_vm3, %v877_v18  ;;  %v1094_v42 = vsel %vm893_vm3, %v1089_v38, 0  ;;  %v1143_v45 = vsel %vm893_vm3, %v1138_v37, 0 }
 0x1fb   : > { %3696 = vmatpush3.bf16.xpose.msra.mxu0 %v1045_v39  ;;  %3697 = vmatprep.mubr.msk.bf16.mxu0 %vm4149_vm1, %v4148_v3 }
 0x1fc   : > { %3707 = vmatprep.subr.bf16.mxu0 %v4148_v3 }
 0x1fd   : > { %v1236_v40 = vpop.permute.xlu0 %1235  ;;  %v1187_v41 = vpop.permute.xlu1 %1186 }
 0x1fe   : > { %3692 = vmatmul.mubr.msk.bf16.vlgmr.msra.gmra.mrb[0].mxu1 %vm893_vm3, %v878_v22  ;;  %v1192_v48 = vsel %vm893_vm3, %v1187_v41, 0  ;;  %v1241_v51 = vsel %vm893_vm3, %v1236_v40, 0 }
 0x1ff   : > { %3702 = vmatpush3.bf16.xpose.msra.mxu1 %v1094_v42  ;;  %3703 = vmatprep.mubr.msk.bf16.mxu1 %vm4149_vm1, %v4148_v3 }
 0x200   : > { %3713 = vmatprep.subr.bf16.mxu1 %v4148_v3 }
 0x201   : > { %v4428_v43 = vpop.permute.xlu1 %1812  ;;  %v4430_v44 = vpop.permute.xlu0 %1809 }
 0x202   : > { %3698 = vmatmul.mubr.msk.bf16.vlgmr.msra.gmra.mrb[12].mxu0 %vm893_vm3, %v879_v21 }
 0x203   : > { %3708 = vmatpush3.bf16.xpose.msra.mxu0 %v1143_v45  ;;  %3709 = vmatprep.mubr.msk.bf16.mxu0 %vm4149_vm1, %v4148_v3 }
 0x204   : > { %3719 = vmatprep.subr.bf16.mxu0 %v4148_v3 }
 0x205   : > { %v4437_v46 = vpop.permute.xlu1 %1821  ;;  %v4439_v47 = vpop.permute.xlu0 %1815 }
 0x206   : > { %3704 = vmatmul.mubr.msk.bf16.vlgmr.msra.gmra.mrb[4].mxu1 %vm893_vm3, %v4375_v25 }
 0x207   : > { %3714 = vmatpush3.bf16.xpose.msra.mxu1 %v1192_v48  ;;  %3715 = vmatprep.mubr.msk.bf16.mxu1 %vm4149_vm1, %v4148_v3 }
 0x208   : > { %3725 = vmatprep.subr.bf16.mxu1 %v4148_v3 }
 0x209   : > { %v4447_v49 = vpop.permute.xlu1 %1827  ;;  %v4449_v50 = vpop.permute.xlu0 %1818 }
 0x20a   : > { %3710 = vmatmul.mubr.msk.bf16.vlgmr.msra.gmra.mrb[16].mxu0 %vm893_vm3, %v4377_v26 }
 0x20b   : > { %3720 = vmatpush3.bf16.xpose.msra.mxu0 %v1241_v51  ;;  %3721 = vmatprep.mubr.msk.bf16.mxu0 %vm4149_vm1, %v4148_v3 }
 0x20c   : > { %3731 = vmatprep.subr.bf16.mxu0 %v4148_v3 }
 0x20d   : > { %v4457_v52 = vpop.permute.xlu0 %1824  ;;  %v1430_v53 = vpop.permute.xlu1 %1429 }
 0x20e   : > { %3716 = vmatmul.mubr.msk.bf16.vlgmr.msra.gmra.mrb[8].mxu1 %vm893_vm3, %v4383_v29  ;;  %v1435_v55 = vsel %vm1385_vm4, %v1430_v53, 0 }
 0x20f   : > { %3727 = vmatprep.mubr.msk.bf16.mxu1 %vm4149_vm1, %v4148_v3 }
 0x211   : > { %v1381_v54 = vpop.permute.xlu0 %1380 }
 0x212   : > { %v1387_v56 = vsel %vm1385_vm4, %v1381_v54, 0  ;;  %3722 = vmatmul.mubr.msk.bf16.vlgmr.msra.gmra.mrb[20].mxu0 %vm893_vm3, %v4385_v30 }
 0x213   : > { %3726 = vmatpush3.bf16.msra.mxu1 %v1387_v56  ;;  %3732 = vmatpush3.bf16.msra.mxu0 %v1435_v55  ;;  %v4489_v55 = vpop.permute.xlu1 %1525 }
 0x214   : > { %3737 = vmatprep.subr.bf16.mxu1 %v4148_v3  ;;  %3733 = vmatprep.mubr.msk.bf16.mxu0 %vm4149_vm1, %v4148_v3 }
 0x215   : > { %3743 = vmatprep.subr.bf16.mxu0 %v4148_v3 }
 0x264   : > { %v934_v58 = vpop.f32.mrb[4].mxu0 }
 0x265   : > { %v935_v59 = vadd.f32 %v3513_v57, %v934_v58  ;;  %v3681_v60 = vpop.f32.mrb[5].mxu0 }
 0x266   : > { %v937_v61 = vpop.f32.mrb[6].mxu0 }
 0x267   : > { %v3682_v62 = vpop.f32.mrb[7].mxu0  ;;  %v1284_v63 = vsel %vm1283_vm5, %v935_v59, -inf }
 0x268   : > { %1285 = vmax.xlane.f32.xlu1 %v1284_v63  ;;  %v1478_v62 = vpop.permute.xlu0 %1477 }
 0x2cd   : > { %v983_v0 = vpop.f32.mrb[8].mxu0 }
 0x2ce   : > { %v984_v1 = vadd.f32 %v3513_v57, %v983_v0  ;;  %v3687_v2 = vpop.f32.mrb[9].mxu0 }
 0x2cf   : > { %v986_v4 = vpop.f32.mrb[10].mxu0 }
 0x2d0   : > { %v3688_v5 = vpop.f32.mrb[11].mxu0  ;;  %v1287_v6 = vsel %vm1283_vm5, %v984_v1, -inf }
 0x2d1   : > { %v1032_v7 = vpop.f32.mrb[0].mxu1  ;;  %1288 = vmax.xlane.f32.xlu0 %v1287_v6 }
 0x2d2   : > { %v1033_v8 = vadd.f32 %v3513_v57, %v1032_v7  ;;  %v3693_v9 = vpop.f32.mrb[1].mxu1 }
 0x2d3   : > { %v1035_v10 = vpop.f32.mrb[2].mxu1 }
 0x2d4   : > { %v3694_v11 = vpop.f32.mrb[3].mxu1  ;;  %v1290_v12 = vsel %vm1283_vm5, %v1033_v8, -inf }
 0x2d5   : > { %1291 = vmax.xlane.f32.xlu0 %v1290_v12  ;;  %v1081_v14 = vpop.f32.mrb[12].mxu0 }
 0x2d6   : > { %v1082_v15 = vadd.f32 %v3513_v57, %v1081_v14  ;;  %v3699_v16 = vpop.f32.mrb[13].mxu0 }
 0x2d7   : > { %v1084_v17 = vpop.f32.mrb[14].mxu0 }
 0x2d8   : > { %v3700_v18 = vpop.f32.mrb[15].mxu0  ;;  %v1293_v19 = vsel %vm1283_vm5, %v1082_v15, -inf }
 0x2d9   : > { %v1130_v20 = vpop.f32.mrb[4].mxu1  ;;  %1294 = vmax.xlane.f32.xlu1 %v1293_v19 }
 0x2da   : > { %v1131_v21 = vadd.f32 %v3513_v57, %v1130_v20  ;;  %v3705_v22 = vpop.f32.mrb[5].mxu1 }
 0x2db   : > { %v1133_v23 = vpop.f32.mrb[6].mxu1 }
 0x2dc   : > { %v3706_v24 = vpop.f32.mrb[7].mxu1  ;;  %v1296_v27 = vsel %vm1283_vm5, %v1131_v21, -inf }
 0x2dd   : > { %1297 = vmax.xlane.f32.xlu0 %v1296_v27  ;;  %v1179_v28 = vpop.f32.mrb[16].mxu0 }
 0x2de   : > { %v4479_v31 = vadd.f32 %v3513_v57, %v1179_v28  ;;  %v3711_v32 = vpop.f32.mrb[17].mxu0 }
 0x2df   : > { %v1182_v33 = vpop.f32.mrb[18].mxu0 }
 0x2e0   : > { %v3712_v34 = vpop.f32.mrb[19].mxu0  ;;  %v1299_v35 = vsel %vm1283_vm5, %v4479_v31, -inf }
 0x2e1   : > { %v1228_v36 = vpop.f32.mrb[8].mxu1  ;;  %1300 = vmax.xlane.f32.xlu1 %v1299_v35 }
 0x2e2   : > { %v1229_v37 = vadd.f32 %v3513_v57, %v1228_v36  ;;  %v3717_v38 = vpop.f32.mrb[9].mxu1 }
 0x2e3   : > { %v1231_v39 = vpop.f32.mrb[10].mxu1 }
 0x2e4   : > { %v3718_v40 = vpop.f32.mrb[11].mxu1  ;;  %v1302_v41 = vsel %vm1283_vm5, %v1229_v37, -inf }
 0x2e5   : > { %1303 = vmax.xlane.f32.xlu0 %v1302_v41  ;;  %v1277_v42 = vpop.f32.mrb[20].mxu0  ;;  %v1483_v40 = vsel %vm1385_vm4, %v1478_v62, 0  ;;  %v4534_v41 = vpack.c.bf16 %v4430_v44, %v4430_v44  ;;  %v4552_v44 = vpack.c.bf16 %v4437_v46, %v4437_v46 }
 0x2e6   : > { %v1278_v45 = vadd.f32 %v3513_v57, %v1277_v42  ;;  %v3723_v48 = vpop.f32.mrb[21].mxu0  ;;  %v4540_v42 = vpack.c.bf16 %v4439_v47, %v4439_v47  ;;  %v4568_v47 = vpack.c.bf16 %v4449_v50, %v4449_v50 }
 0x2e7   : > { %v1280_v51 = vpop.f32.mrb[22].mxu0  ;;  %v4556_v48 = vpack.c.bf16 %v4428_v43, %v4428_v43  ;;  %v4576_v43 = vpack.c.bf16 %v4457_v52, %v4457_v52 }
 0x2e8   : > { %v3724_v53 = vpop.f32.mrb[23].mxu0  ;;  %v1305_v54 = vsel %vm1283_vm5, %v1278_v45, -inf }
 0x2e9   : > { %1306 = vmax.xlane.f32.xlu1 %v1305_v54 }
 0x2f5   : > { %v1286_v56 = vpop.xlane.xlu1 %1285 }
 0x2f6   : > { %v1308_v58 = vsub.f32 %v935_v59, %v1286_v56 }
 0x2f8   : > { %v1316_v60 = vmul.f32 1.442695, %v1308_v58 }
 0x2fa   : > { %1621 = vrot.lane.b32.xlu1 %v4377_v26, %s4158_s15  ;;  %3989 = vpow2.f32 %v1316_v60  ;;  %v1531_v60 = vsel %vm1385_vm4, %v4489_v55, 0 }
 0x2fb   : > { %1573 = vrot.lane.b32.xlu0 %v4375_v25, %s4158_s15 }
 0x304   : > { %v3990_v61 = vpop.eup %3989 }
 0x305   : > { %v1332_v57 = vsel %vm1283_vm5, %v3990_v61, 0.0 }
 0x31e   : > { %1333 = vadd.xlane.f32.xlu1 %v1332_v57 }
 0x35e   : > { %v1289_v63 = vpop.xlane.xlu0 %1288 }
 0x35f   : > { %v1309_v0 = vsub.f32 %v984_v1, %v1289_v63 }
 0x361   : > { %v1318_v2 = vmul.f32 1.442695, %v1309_v0 }
 0x362   : > { %v1292_v4 = vpop.xlane.xlu0 %1291 }
 0x363   : > { %3991 = vpow2.f32 %v1318_v2  ;;  %v1310_v26 = vsub.f32 %v1033_v8, %v1292_v4 }
 0x365   : > { %v1320_v5 = vmul.f32 1.442695, %v1310_v26 }
 0x366   : > { %v1295_v6 = vpop.xlane.xlu1 %1294 }
 0x367   : > { %3993 = vpow2.f32 %v1320_v5  ;;  %v1311_v25 = vsub.f32 %v1082_v15, %v1295_v6 }
 0x369   : > { %v1322_v7 = vmul.f32 1.442695, %v1311_v25 }
 0x36a   : > { %v1298_v9 = vpop.xlane.xlu0 %1297 }
 0x36b   : > { %3995 = vpow2.f32 %v1322_v7  ;;  %v1312_v59 = vsub.f32 %v1131_v21, %v1298_v9 }
 0x36d   : > { %v4492_v10 = vpop.eup %3991  ;;  %v1324_v11 = vmul.f32 1.442695, %v1312_v59 }
 0x36e   : > { %v1335_v12 = vsel %vm1283_vm5, %v4492_v10, 0.0  ;;  %v1301_v18 = vpop.xlane.xlu1 %1300 }
 0x36f   : > { %3997 = vpow2.f32 %v1324_v11  ;;  %1336 = vadd.xlane.f32.xlu1 %v1335_v12  ;;  %v1313_v19 = vsub.f32 %v4479_v31, %v1301_v18 }
 0x371   : > { %v4496_v1 = vpop.eup %3993  ;;  %v1326_v23 = vmul.f32 1.442695, %v1313_v19 }
 0x372   : > { %v1338_v8 = vsel %vm1283_vm5, %v4496_v1, 0.0  ;;  %v1304_v20 = vpop.xlane.xlu0 %1303 }
 0x373   : > { %1339 = vadd.xlane.f32.xlu0 %v1338_v8  ;;  %v1314_v22 = vsub.f32 %v1229_v37, %v1304_v20  ;;  %3999 = vpow2.f32 %v1326_v23 }
 0x375   : > { %v4500_v14 = vpop.eup %3995  ;;  %v1328_v27 = vmul.f32 1.442695, %v1314_v22 }
 0x376   : > { %v1341_v15 = vsel %vm1283_vm5, %v4500_v14, 0.0  ;;  %v1307_v21 = vpop.xlane.xlu1 %1306  ;;  %v1574_v46 = vpop.permute.xlu0 %1573 }
 0x377   : > { %1342 = vadd.xlane.f32.xlu1 %v1341_v15  ;;  %v1315_v24 = vsub.f32 %v1278_v45, %v1307_v21  ;;  %4001 = vpow2.f32 %v1328_v27  ;;  %v4544_v45 = vpack.c.bf16 %v4362_v13, %v4362_v13  ;;  %v4564_v13 = vpack.c.bf16 %v4447_v49, %v4447_v49 }
 0x378   : > { %v1579_v63 = vsel %vm1385_vm4, %v1574_v46, 0 }
 0x379   : > { %v4504_v16 = vpop.eup %3997  ;;  %v1330_v28 = vmul.f32 1.442695, %v1315_v24 }
 0x37a   : > { %v1344_v17 = vsel %vm1283_vm5, %v4504_v16, 0.0  ;;  %v4513_v32 = vpop.permute.xlu1 %1621 }
 0x37b   : > { %1345 = vadd.xlane.f32.xlu0 %v1344_v17  ;;  %4003 = vpow2.f32 %v1330_v28  ;;  %v1627_v4 = vsel %vm1385_vm4, %v4513_v32, 0 }
 0x37d   : > { %v4515_v33 = vpop.eup %3999 }
 0x37e   : > { %v1347_v31 = vsel %vm1283_vm5, %v4515_v33, 0.0 }
 0x388   : > { %1717 = vrot.lane.b32.xlu1 %v4385_v30, %s4158_s15  ;;  %v4517_v30 = vpop.eup %4001 }
 0x389   : > { %v4521_v34 = vpop.eup %4003  ;;  %v1350_v35 = vsel %vm1283_vm5, %v4517_v30, 0.0 }
 0x38a   : > { %v1353_v36 = vsel %vm1283_vm5, %v4521_v34, 0.0 }
 0x391   : > { %1669 = vrot.lane.b32.xlu0 %v4383_v29, %s4158_s15 }
 0x3ab   : > { %v1334_v29 = vpop.xlane.xlu1 %1333 }
 0x3ac   : > { %4005 = vrcp.f32 %v1334_v29  ;;  %1348 = vadd.xlane.f32.xlu1 %v1347_v31 }
 0x3b0   : > { %1351 = vadd.xlane.f32.xlu0 %v1350_v35  ;;  %1354 = vadd.xlane.f32.xlu1 %v1353_v36 }
 0x3b6   : > { %v4006_v37 = vpop.eup %4005 }
 0x3b7   : > { %v1364_v38 = vmul.f32 %v4006_v37, %v3990_v61 }
 0x3b9   : > { %v1372_v39 = vpack.c.bf16 %v1364_v38, %v1364_v38 }
 0x3bb   : > { %3728 = vmatmul.mubr.msk.bf16.vlgmr.msra.gmra.mrb[12].mxu1 %vm1283_vm5, %v1372_v39 }
 0x3bc   : > { %3738 = vmatpush3.bf16.msra.mxu1 %v1483_v40  ;;  %3739 = vmatprep.mubr.msk.bf16.mxu1 %vm4149_vm1, %v4148_v3 }
 0x3bd   : > { %3749 = vmatprep.subr.bf16.mxu1 %v4148_v3 }
 0x3c1   : > { %1894 = vrot.lane.b32.xlu1 %v4534_v41, %s4157_s28 }
 0x3c5   : > { %1992 = vrot.lane.b32.xlu1 %v4540_v42, %s4157_s28 }
 0x3c6   : > { %1845 = vrot.lane.b32.xlu0 %v4544_v45, %s4157_s28 }
 0x3c9   : > { %2090 = vrot.lane.b32.xlu1 %v4552_v44, %s4157_s28 }
 0x3ca   : > { %1943 = vrot.lane.b32.xlu0 %v4556_v48, %s4157_s28 }
 0x3cd   : > { %2188 = vrot.lane.b32.xlu1 %v4564_v13, %s4157_s28 }
 0x3ce   : > { %2041 = vrot.lane.b32.xlu0 %v4568_v47, %s4157_s28 }
 0x3d1   : > { %2332 = vrot.lane.b32.xlu1 %v4544_v45, %s4158_s15 }
 0x3d2   : > { %2139 = vrot.lane.b32.xlu0 %v4576_v43, %s4157_s28  ;;  %s4163_s28 = smov 20  }
 0x3fc   : > { %v1337_v49 = vpop.xlane.xlu1 %1336 }
 0x3fd   : > { %4007 = vrcp.f32 %v1337_v49 }
 0x400   : > { %v1340_v50 = vpop.xlane.xlu0 %1339 }
 0x401   : > { %4009 = vrcp.f32 %v1340_v50 }
 0x404   : > { %v1343_v51 = vpop.xlane.xlu1 %1342 }
 0x405   : > { %4011 = vrcp.f32 %v1343_v51 }
 0x407   : > { %v4008_v53 = vpop.eup %4007 }
 0x408   : > { %v1365_v54 = vmul.f32 %v4008_v53, %v4492_v10  ;;  %v1346_v56 = vpop.xlane.xlu0 %1345  ;;  %v1718_v7 = vpop.permute.xlu1 %1717 }
 0x409   : > { %4013 = vrcp.f32 %v1346_v56  ;;  %v1723_v15 = vsel %vm1385_vm4, %v1718_v7, 0 }
 0x40a   : > { %v1373_v52 = vpack.c.bf16 %v1365_v54, %v1365_v54 }
 0x40b   : > { %v4010_v58 = vpop.eup %4009 }
 0x40c   : > { %v1366_v61 = vmul.f32 %v4010_v58, %v4496_v1  ;;  %3734 = vmatmul.mubr.msk.bf16.vlgmr.msra.gmra.mrb[24].mxu0 %vm1283_vm5, %v1373_v52  ;;  %v1670_v5 = vpop.permute.xlu0 %1669 }
 0x40d   : > { %3744 = vmatpush3.bf16.msra.mxu0 %v1531_v60  ;;  %3745 = vmatprep.mubr.msk.bf16.mxu0 %vm4149_vm1, %v4148_v3  ;;  %v1675_v25 = vsel %vm1385_vm4, %v1670_v5, 0 }
 0x40e   : > { %v1374_v57 = vpack.c.bf16 %v1366_v61, %v1366_v61  ;;  %3755 = vmatprep.subr.bf16.mxu0 %v4148_v3 }
 0x40f   : > { %v4012_v62 = vpop.eup %4011 }
 0x410   : > { %v1367_v0 = vmul.f32 %v4012_v62, %v4500_v14  ;;  %3740 = vmatmul.mubr.msk.bf16.vlgmr.msra.gmra.mrb[16].mxu1 %vm1283_vm5, %v1374_v57 }
 0x411   : > { %3750 = vmatpush3.bf16.msra.mxu1 %v1579_v63  ;;  %3751 = vmatprep.mubr.msk.bf16.mxu1 %vm4149_vm1, %v4148_v3 }
 0x412   : > { %v1375_v55 = vpack.c.bf16 %v1367_v0, %v1367_v0  ;;  %3761 = vmatprep.subr.bf16.mxu1 %v4148_v3 }
 0x413   : > { %v4014_v2 = vpop.eup %4013 }
 0x414   : > { %v1368_v26 = vmul.f32 %v4014_v2, %v4504_v16  ;;  %3746 = vmatmul.mubr.msk.bf16.vlgmr.msra.gmra.mrb[28].mxu0 %vm1283_vm5, %v1375_v55 }
 0x415   : > { %3756 = vmatpush3.bf16.msra.mxu0 %v1627_v4  ;;  %3757 = vmatprep.mubr.msk.bf16.mxu0 %vm4149_vm1, %v4148_v3 }
 0x416   : > { %v1376_v6 = vpack.c.bf16 %v1368_v26, %v1368_v26  ;;  %3767 = vmatprep.subr.bf16.mxu0 %v4148_v3 }
 0x418   : > { %3752 = vmatmul.mubr.msk.bf16.vlgmr.msra.gmra.mrb[20].mxu1 %vm1283_vm5, %v1376_v6 }
 0x419   : > { %3762 = vmatpush3.bf16.msra.mxu1 %v1675_v25  ;;  %3763 = vmatprep.mubr.msk.bf16.mxu1 %vm4149_vm1, %v4148_v3 }
 0x41a   : > { %3773 = vmatprep.subr.bf16.mxu1 %v4148_v3 }
 0x439   : > { %v1349_v9 = vpop.xlane.xlu1 %1348 }
 0x43a   : > { %4015 = vrcp.f32 %v1349_v9 }
 0x43d   : > { %v1352_v59 = vpop.xlane.xlu0 %1351  ;;  %v1355_v10 = vpop.xlane.xlu1 %1354 }
 0x43e   : > { %4017 = vrcp.f32 %v1352_v59 }
 0x43f   : > { %4019 = vrcp.f32 %v1355_v10 }
 0x441   : > { %v1846_v17 = vpop.permute.xlu0 %1845  ;;  %v1895_v21 = vpop.permute.xlu1 %1894 }
 0x442   : > { %v1851_v20 = vsel %vm893_vm3, %v1846_v17, 0  ;;  %v1900_v23 = vsel %vm893_vm3, %v1895_v21, 0 }
 0x444   : > { %v4016_v11 = vpop.eup %4015 }
 0x445   : > { %v1369_v12 = vmul.f32 %v4016_v11, %v4515_v33  ;;  %v1944_v24 = vpop.permute.xlu0 %1943  ;;  %v1993_v28 = vpop.permute.xlu1 %1992 }
 0x446   : > { %v1949_v27 = vsel %vm893_vm3, %v1944_v24, 0  ;;  %v1998_v32 = vsel %vm893_vm3, %v1993_v28, 0 }
 0x447   : > { %v1377_v1 = vpack.c.bf16 %v1369_v12, %v1369_v12 }
 0x448   : > { %v4018_v8 = vpop.eup %4017 }
 0x449   : > { %v4020_v14 = vpop.eup %4019  ;;  %v1370_v16 = vmul.f32 %v4018_v8, %v4517_v30  ;;  %3758 = vmatmul.mubr.msk.bf16.vlgmr.msra.gmra.mrb[32].mxu0 %vm1283_vm5, %v1377_v1  ;;  %v2042_v33 = vpop.permute.xlu0 %2041  ;;  %v3530_v8 = vld [vmem:[%s5020_s14 + $0x1] ss:$0 sm:$0xff] }
 0x44a   : > { %3768 = vmatpush3.bf16.msra.mxu0 %v1723_v15  ;;  %3769 = vmatprep.mubr.msk.bf16.mxu0 %vm4149_vm1, %v4148_v3  ;;  %v1371_v18 = vmul.f32 %v4020_v14, %v4521_v34  ;;  %v2047_v30 = vsel %vm893_vm3, %v2042_v33, 0  ;;  %v2091_v29 = vpop.permute.xlu1 %2090 }
 0x44b   : > { %v1378_v19 = vpack.c.bf16 %v1370_v16, %v1370_v16  ;;  %3779 = vmatprep.subr.bf16.mxu0 %v4148_v3  ;;  %v2096_v31 = vsel %vm893_vm3, %v2091_v29, 0 }
 0x44c   : > { %v1379_v22 = vpack.c.bf16 %v1371_v18, %v1371_v18 }
 0x44d   : > { %3764 = vmatmul.mubr.msk.bf16.vlgmr.msra.gmra.mrb[24].mxu1 %vm1283_vm5, %v1378_v19  ;;  %v2140_v34 = vpop.permute.xlu0 %2139 }
 0x44e   : > { %3774 = vmatpush3.bf16.xpose.msra.mxu1 %v1851_v20  ;;  %3775 = vmatprep.mubr.msk.bf16.mxu1 %vm4149_vm1, %v4148_v3  ;;  %v2189_v35 = vpop.permute.xlu1 %2188  ;;  %v2145_v36 = vsel %vm893_vm3, %v2140_v34, 0 }
 0x44f   : > { %3785 = vmatprep.subr.bf16.mxu1 %v4148_v3  ;;  %v2194_v37 = vsel %vm893_vm3, %v2189_v35, 0 }
 0x451   : > { %3770 = vmatmul.mubr.msk.bf16.vlgmr.msra.gmra.mrb[36].mxu0 %vm1283_vm5, %v1379_v22 }
 0x452   : > { %3781 = vmatprep.mubr.msk.bf16.mxu0 %vm4149_vm1, %v4148_v3  ;;  %v2333_v38 = vpop.permute.xlu1 %2332 }
 0x453   : > { %3780 = vmatpush3.bf16.xpose.msra.mxu0 %v1900_v23  ;;  %v2338_v39 = vsel %vm1385_vm4, %v2333_v38, 0 }
 0x454   : > { %3791 = vmatprep.subr.bf16.mxu0 %v4148_v3 }
 0x455   : > { %3776 = vmatmul.mubr.msk.bf16.vlgmr.msra.gmra.mrb[28].mxu1 %vm893_vm3, %v4544_v45 }
 0x456   : > { %3786 = vmatpush3.bf16.xpose.msra.mxu1 %v1949_v27  ;;  %3787 = vmatprep.mubr.msk.bf16.mxu1 %vm4149_vm1, %v4148_v3 }
 0x457   : > { %3797 = vmatprep.subr.bf16.mxu1 %v4148_v3 }
 0x45a   : > { %3782 = vmatmul.mubr.msk.bf16.vlgmr.msra.gmra.mrb[40].mxu0 %vm893_vm3, %v4534_v41 }
 0x45b   : > { %3792 = vmatpush3.bf16.xpose.msra.mxu0 %v1998_v32  ;;  %3793 = vmatprep.mubr.msk.bf16.mxu0 %vm4149_vm1, %v4148_v3 }
 0x45c   : > { %3803 = vmatprep.subr.bf16.mxu0 %v4148_v3 }
 0x45d   : > { %3788 = vmatmul.mubr.msk.bf16.vlgmr.msra.gmra.mrb[32].mxu1 %vm893_vm3, %v4556_v48 }
 0x45e   : > { %3798 = vmatpush3.bf16.xpose.msra.mxu1 %v2047_v30  ;;  %3799 = vmatprep.mubr.msk.bf16.mxu1 %vm4149_vm1, %v4148_v3 }
 0x45f   : > { %3809 = vmatprep.subr.bf16.mxu1 %v4148_v3 }
 0x462   : > { %3794 = vmatmul.mubr.msk.bf16.vlgmr.msra.gmra.mrb[44].mxu0 %vm893_vm3, %v4540_v42 }
 0x463   : > { %3804 = vmatpush3.bf16.xpose.msra.mxu0 %v2096_v31  ;;  %3805 = vmatprep.mubr.msk.bf16.mxu0 %vm4149_vm1, %v4148_v3 }
 0x464   : > { %3815 = vmatprep.subr.bf16.mxu0 %v4148_v3 }
 0x465   : > { %3800 = vmatmul.mubr.msk.bf16.vlgmr.msra.gmra.mrb[36].mxu1 %vm893_vm3, %v4568_v47 }
 0x466   : > { %3810 = vmatpush3.bf16.xpose.msra.mxu1 %v2145_v36  ;;  %3811 = vmatprep.mubr.msk.bf16.mxu1 %vm4149_vm1, %v4148_v3 }
 0x467   : > { %3821 = vmatprep.subr.bf16.mxu1 %v4148_v3 }
 0x46a   : > { %3806 = vmatmul.mubr.msk.bf16.vlgmr.msra.gmra.mrb[48].mxu0 %vm893_vm3, %v4552_v44 }
 0x46b   : > { %3816 = vmatpush3.bf16.xpose.msra.mxu0 %v2194_v37  ;;  %3817 = vmatprep.mubr.msk.bf16.mxu0 %vm4149_vm1, %v4148_v3 }
 0x46c   : > { %3827 = vmatprep.subr.bf16.mxu0 %v4148_v3 }
 0x46d   : > { %3812 = vmatmul.mubr.msk.bf16.vlgmr.msra.gmra.mrb[40].mxu1 %vm893_vm3, %v4576_v43 }
 0x46e   : > { %3822 = vmatpush3.bf16.msra.mxu1 %v2338_v39  ;;  %3823 = vmatprep.mubr.msk.bf16.mxu1 %vm4149_vm1, %v4148_v3 }
 0x46f   : > { %3833 = vmatprep.subr.bf16.mxu1 %v4148_v3 }
 0x472   : > { %3818 = vmatmul.mubr.msk.bf16.vlgmr.msra.gmra.mrb[52].mxu0 %vm893_vm3, %v4564_v13 }
 0x473   : > { %3829 = vmatprep.mubr.msk.bf16.mxu0 %vm4149_vm1, %v4148_v3 }
 0x48e   : > { %v1423_v40 = vpop.f32.mrb[12].mxu1 }
 0x48f   : > { %1765 = vst.msk [vmem:[#allocation3] sm:$0xff] %vm893_vm3, %v1423_v40  ;;  %v3729_v45 = vpop.f32.mrb[13].mxu1 }
 0x490   : > { %v1426_v46 = vpop.f32.mrb[14].mxu1 }
 0x491   : > { %v3730_v49 = vpop.f32.mrb[15].mxu1 }
 0x4df   : > { %v4673_v50 = vpop.f32.mrb[24].mxu0 }
 0x4e0   : > { %v3735_v51 = vpop.f32.mrb[25].mxu0 }
 0x4e1   : > { %v1474_v53 = vpop.f32.mrb[26].mxu0 }
 0x4e2   : > { %v3736_v54 = vpop.f32.mrb[27].mxu0 }
 0x4e3   : > { %v4675_v56 = vpop.f32.mrb[16].mxu1 }
 0x4e4   : > { %v3741_v52 = vpop.f32.mrb[17].mxu1 }
 0x4e5   : > { %v1522_v58 = vpop.f32.mrb[18].mxu1 }
 0x4e6   : > { %v3742_v60 = vpop.f32.mrb[19].mxu1 }
 0x4e7   : > { %v4677_v61 = vpop.f32.mrb[28].mxu0 }
 0x4e8   : > { %v3747_v57 = vpop.f32.mrb[29].mxu0 }
 0x4e9   : > { %v1570_v62 = vpop.f32.mrb[30].mxu0 }
 0x4ea   : > { %v3748_v63 = vpop.f32.mrb[31].mxu0 }
 0x4eb   : > { %v4679_v0 = vpop.f32.mrb[20].mxu1 }
 0x4ec   : > { %v3753_v55 = vpop.f32.mrb[21].mxu1 }
 0x4ed   : > { %v1618_v2 = vpop.f32.mrb[22].mxu1 }
 0x4ee   : > { %v3754_v4 = vpop.f32.mrb[23].mxu1 }
 0x51c   : > { %v4681_v26 = vpop.f32.mrb[32].mxu0 }
 0x51d   : > { %v3759_v5 = vpop.f32.mrb[33].mxu0 }
 0x51e   : > { %v1666_v6 = vpop.f32.mrb[34].mxu0 }
 0x51f   : > { %v3760_v25 = vpop.f32.mrb[35].mxu0 }
 0x520   : > { %v4683_v7 = vpop.f32.mrb[24].mxu1 }
 0x521   : > { %v3765_v9 = vpop.f32.mrb[25].mxu1 }
 0x522   : > { %v1714_v59 = vpop.f32.mrb[26].mxu1 }
 0x523   : > { %v3766_v10 = vpop.f32.mrb[27].mxu1 }
 0x524   : > { %v4685_v11 = vpop.f32.mrb[36].mxu0 }
 0x525   : > { %v3771_v12 = vpop.f32.mrb[37].mxu0 }
 0x526   : > { %v1762_v1 = vpop.f32.mrb[38].mxu0 }
 0x527   : > { %v3772_v14 = vpop.f32.mrb[39].mxu0 }
 0x528   : > { %v1887_v15 = vpop.f32.mrb[28].mxu1 }
 0x529   : > { %v1888_v16 = vadd.f32 %v3530_v8, %v1887_v15  ;;  %v3777_v17 = vpop.f32.mrb[29].mxu1 }
 0x52a   : > { %v1890_v18 = vpop.f32.mrb[30].mxu1 }
 0x52b   : > { %v3778_v19 = vpop.f32.mrb[31].mxu1  ;;  %v2236_v20 = vsel %vm1283_vm5, %v1888_v16, -inf }
 0x52c   : > { %2237 = vmax.xlane.f32.xlu0 %v2236_v20 }
 0x52d   : > { %v1936_v21 = vpop.f32.mrb[40].mxu0 }
 0x52e   : > { %v1937_v22 = vadd.f32 %v3530_v8, %v1936_v21  ;;  %v3783_v23 = vpop.f32.mrb[41].mxu0 }
 0x52f   : > { %v1939_v24 = vpop.f32.mrb[42].mxu0 }
 0x530   : > { %v3784_v27 = vpop.f32.mrb[43].mxu0  ;;  %v1985_v28 = vpop.f32.mrb[32].mxu1  ;;  %v2239_v32 = vsel %vm1283_vm5, %v1937_v22, -inf }
 0x531   : > { %v1986_v33 = vadd.f32 %v3530_v8, %v1985_v28  ;;  %2240 = vmax.xlane.f32.xlu1 %v2239_v32  ;;  %v3789_v30 = vpop.f32.mrb[33].mxu1 }
 0x532   : > { %v1988_v29 = vpop.f32.mrb[34].mxu1 }
 0x533   : > { %v3790_v31 = vpop.f32.mrb[35].mxu1  ;;  %v2242_v34 = vsel %vm1283_vm5, %v1986_v33, -inf }
 0x534   : > { %2243 = vmax.xlane.f32.xlu0 %v2242_v34 }
 0x535   : > { %v2034_v35 = vpop.f32.mrb[44].mxu0 }
 0x536   : > { %v2035_v36 = vadd.f32 %v3530_v8, %v2034_v35  ;;  %v3795_v37 = vpop.f32.mrb[45].mxu0 }
 0x537   : > { %v2037_v38 = vpop.f32.mrb[46].mxu0 }
 0x538   : > { %v3796_v39 = vpop.f32.mrb[47].mxu0  ;;  %v2083_v40 = vpop.f32.mrb[36].mxu1  ;;  %v2245_v45 = vsel %vm1283_vm5, %v2035_v36, -inf }
 0x539   : > { %v4694_v46 = vadd.f32 %v3530_v8, %v2083_v40  ;;  %2246 = vmax.xlane.f32.xlu0 %v2245_v45  ;;  %v3801_v49 = vpop.f32.mrb[37].mxu1 }
 0x53a   : > { %v2086_v51 = vpop.f32.mrb[38].mxu1 }
 0x53b   : > { %v3802_v53 = vpop.f32.mrb[39].mxu1  ;;  %v2248_v54 = vsel %vm1283_vm5, %v4694_v46, -inf }
 0x53c   : > { %2249 = vmax.xlane.f32.xlu1 %v2248_v54 }
 0x53d   : > { %v2132_v52 = vpop.f32.mrb[48].mxu0 }
 0x53e   : > { %v4698_v58 = vadd.f32 %v3530_v8, %v2132_v52  ;;  %v3807_v60 = vpop.f32.mrb[49].mxu0 }
 0x53f   : > { %v2135_v57 = vpop.f32.mrb[50].mxu0 }
 0x540   : > { %v3808_v62 = vpop.f32.mrb[51].mxu0  ;;  %v2181_v63 = vpop.f32.mrb[40].mxu1  ;;  %v2251_v55 = vsel %vm1283_vm5, %v4698_v58, -inf }
 0x541   : > { %v2182_v2 = vadd.f32 %v3530_v8, %v2181_v63  ;;  %2252 = vmax.xlane.f32.xlu0 %v2251_v55  ;;  %v3813_v4 = vpop.f32.mrb[41].mxu1 }
 0x542   : > { %v2184_v5 = vpop.f32.mrb[42].mxu1 }
 0x543   : > { %v3814_v6 = vpop.f32.mrb[43].mxu1  ;;  %v2254_v25 = vsel %vm1283_vm5, %v2182_v2, -inf }
 0x544   : > { %2255 = vmax.xlane.f32.xlu1 %v2254_v25 }
 0x545   : > { %v2230_v9 = vpop.f32.mrb[52].mxu0 }
 0x546   : > { %v2231_v59 = vadd.f32 %v3530_v8, %v2230_v9  ;;  %v3819_v10 = vpop.f32.mrb[53].mxu0 }
 0x547   : > { %v2233_v12 = vpop.f32.mrb[54].mxu0 }
 0x548   : > { %v3820_v1 = vpop.f32.mrb[55].mxu0  ;;  %v2257_v14 = vsel %vm1283_vm5, %v2231_v59, -inf }
 0x549   : > { %2258 = vmax.xlane.f32.xlu0 %v2257_v14 }
 0x555   : > { %2428 = vrot.lane.b32.xlu1 %v4556_v48, %s4158_s15 }
 0x559   : > { %2476 = vrot.lane.b32.xlu1 %v4540_v42, %s4158_s15 }
 0x55f   : > { %2380 = vrot.lane.b32.xlu0 %v4534_v41, %s4158_s15 }
 0x5b9   : > { %v2238_v15 = vpop.xlane.xlu0 %2237 }
 0x5ba   : > { %v2260_v17 = vsub.f32 %v1888_v16, %v2238_v15 }
 0x5bc   : > { %v2268_v18 = vmul.f32 1.442695, %v2260_v17 }
 0x5be   : > { %4021 = vpow2.f32 %v2268_v18  ;;  %v2241_v8 = vpop.xlane.xlu1 %2240 }
 0x5bf   : > { %v2261_v19 = vsub.f32 %v1937_v22, %v2241_v8 }
 0x5c1   : > { %v2270_v20 = vmul.f32 1.442695, %v2261_v19  ;;  %v2244_v21 = vpop.xlane.xlu0 %2243 }
 0x5c2   : > { %v2262_v23 = vsub.f32 %v1986_v33, %v2244_v21 }
 0x5c3   : > { %4023 = vpow2.f32 %v2270_v20 }
 0x5c4   : > { %v2272_v24 = vmul.f32 1.442695, %v2262_v23 }
 0x5c6   : > { %4025 = vpow2.f32 %v2272_v24  ;;  %v2247_v27 = vpop.xlane.xlu0 %2246 }
 0x5c7   : > { %v2263_v48 = vsub.f32 %v2035_v36, %v2247_v27 }
 0x5c8   : > { %v4710_v28 = vpop.eup %4021 }
 0x5c9   : > { %v2274_v42 = vmul.f32 1.442695, %v2263_v48  ;;  %v2284_v41 = vsel %vm1283_vm5, %v4710_v28, 0.0  ;;  %v2250_v37 = vpop.xlane.xlu1 %2249 }
 0x5ca   : > { %2285 = vadd.xlane.f32.xlu1 %v2284_v41  ;;  %v2264_v38 = vsub.f32 %v4694_v46, %v2250_v37 }
 0x5cb   : > { %4027 = vpow2.f32 %v2274_v42 }
 0x5cc   : > { %v2276_v40 = vmul.f32 1.442695, %v2264_v38 }
 0x5cd   : > { %v4714_v16 = vpop.eup %4023 }
 0x5ce   : > { %v2287_v22 = vsel %vm1283_vm5, %v4714_v16, 0.0  ;;  %v2253_v30 = vpop.xlane.xlu0 %2252  ;;  %4029 = vpow2.f32 %v2276_v40 }
 0x5cf   : > { %2288 = vadd.xlane.f32.xlu0 %v2287_v22  ;;  %v2265_v49 = vsub.f32 %v4698_v58, %v2253_v30 }
 0x5d0   : > { %v4718_v32 = vpop.eup %4025 }
 0x5d1   : > { %v2290_v33 = vsel %vm1283_vm5, %v4718_v32, 0.0  ;;  %v2256_v39 = vpop.xlane.xlu1 %2255  ;;  %v2278_v53 = vmul.f32 1.442695, %v2265_v49 }
 0x5d2   : > { %2291 = vadd.xlane.f32.xlu1 %v2290_v33  ;;  %v2266_v45 = vsub.f32 %v2182_v2, %v2256_v39 }
 0x5d4   : > { %v2280_v51 = vmul.f32 1.442695, %v2266_v45 }
 0x5d5   : > { %v4722_v29 = vpop.eup %4027 }
 0x5d6   : > { %v2259_v31 = vpop.xlane.xlu0 %2258  ;;  %v2293_v34 = vsel %vm1283_vm5, %v4722_v29, 0.0  ;;  %4031 = vpow2.f32 %v2280_v51 }
 0x5d7   : > { %2294 = vadd.xlane.f32.xlu0 %v2293_v34  ;;  %v2267_v54 = vsub.f32 %v2231_v59, %v2259_v31  ;;  %4033 = vpow2.f32 %v2278_v53 }
 0x5d9   : > { %v2282_v52 = vmul.f32 1.442695, %v2267_v54 }
 0x5da   : > { %v2381_v35 = vpop.permute.xlu0 %2380 }
 0x5db   : > { %v2386_v36 = vsel %vm1385_vm4, %v2381_v35, 0  ;;  %4035 = vpow2.f32 %v2282_v52 }
 0x5dc   : > { %3828 = vmatpush3.bf16.msra.mxu0 %v2386_v36 }
 0x5dd   : > { %3839 = vmatprep.subr.bf16.mxu0 %v4148_v3 }
 0x5e3   : > { %2572 = vrot.lane.b32.xlu1 %v4552_v44, %s4158_s15  ;;  %v4734_v44 = vpop.eup %4029 }
 0x5e4   : > { %v4738_v60 = vpop.eup %4031 }
 0x5e5   : > { %v4740_v46 = vpop.eup %4033  ;;  %v2302_v58 = vsel %vm1283_vm5, %v4738_v60, 0.0 }
 0x5e6   : > { %v2299_v57 = vsel %vm1283_vm5, %v4740_v46, 0.0  ;;  %v4746_v62 = vpop.eup %4035 }
 0x5e7   : > { %v2305_v63 = vsel %vm1283_vm5, %v4746_v62, 0.0 }
 0x5ed   : > { %2524 = vrot.lane.b32.xlu0 %v4568_v47, %s4158_s15  ;;  %v2296_v47 = vsel %vm1283_vm5, %v4734_v44, 0.0 }
 0x607   : > { %2297 = vadd.xlane.f32.xlu1 %v2296_v47 }
 0x60b   : > { %2303 = vadd.xlane.f32.xlu1 %v2302_v58 }
 0x60c   : > { %2300 = vadd.xlane.f32.xlu0 %v2299_v57 }
 0x610   : > { %2306 = vadd.xlane.f32.xlu0 %v2305_v63 }
 0x61c   : > { %2668 = vrot.lane.b32.xlu1 %v4564_v13, %s4158_s15  ;;  %v2429_v13 = vpop.permute.xlu1 %2428 }
 0x626   : > { %2620 = vrot.lane.b32.xlu0 %v4576_v43, %s4158_s15  ;;  %s4164_s15 = smov 24   ;;  %v2477_v43 = vpop.permute.xlu1 %2476 }
 0x627   : > { %v2482_v9 = vsel %vm1385_vm4, %v2477_v43, 0 }
 0x62a   : > { %1767 = vrot.lane.b32.xlu0 %v4673_v50, %s4159_s1 }
 0x62e   : > { %1773 = vrot.lane.b32.xlu0 %v4675_v56, %s4160_s4 }
 0x632   : > { %1779 = vrot.lane.b32.xlu0 %v4677_v61, %s4161_s27 }
 0x636   : > { %1785 = vrot.lane.b32.xlu0 %v4679_v0, %s4162_s22 }
 0x63a   : > { %1791 = vrot.lane.b32.xlu0 %v4681_v26, %s4163_s28 }
 0x63e   : > { %1797 = vrot.lane.b32.xlu0 %v4683_v7, %s4164_s15  ;;  %v2434_v7 = vsel %vm1385_vm4, %v2429_v13, 0 }
 0x642   : > { %1803 = vrot.lane.b32.xlu0 %v4685_v11, %s4165_s21 }
 0x657   : > { %v2286_v50 = vpop.xlane.xlu1 %2285 }
 0x658   : > { %4037 = vrcp.f32 %v2286_v50 }
 0x65c   : > { %v2289_v56 = vpop.xlane.xlu0 %2288 }
 0x65d   : > { %4039 = vrcp.f32 %v2289_v56 }
 0x65f   : > { %v2292_v61 = vpop.xlane.xlu1 %2291 }
 0x660   : > { %4041 = vrcp.f32 %v2292_v61 }
 0x662   : > { %v4038_v0 = vpop.eup %4037 }
 0x663   : > { %v2316_v55 = vmul.f32 %v4038_v0, %v4710_v28  ;;  %v2573_v15 = vpop.permute.xlu1 %2572 }
 0x664   : > { %v2295_v26 = vpop.xlane.xlu0 %2294  ;;  %v2578_v18 = vsel %vm1385_vm4, %v2573_v15, 0 }
 0x665   : > { %4043 = vrcp.f32 %v2295_v26  ;;  %v2324_v2 = vpack.c.bf16 %v2316_v55, %v2316_v55  ;;  %v3977_v55 = vld [vmem:[%s5021_s16] sm:$0xff]  }
 0x667   : > { %v4040_v4 = vpop.eup %4039  ;;  %3824 = vmatmul.mubr.msk.bf16.vlgmr.msra.gmra.mrb[44].mxu1 %vm1283_vm5, %v2324_v2 }
 0x668   : > { %v2317_v11 = vmul.f32 %v4040_v4, %v4714_v16  ;;  %3834 = vmatpush3.bf16.msra.mxu1 %v2434_v7  ;;  %3835 = vmatprep.mubr.msk.bf16.mxu1 %vm4149_vm1, %v4148_v3  ;;  %v2525_v59 = vpop.permute.xlu0 %2524  ;;  %v3978_v4 = vld [vmem:[%s5021_s16 + $0x8] sm:$0xff]  }
 0x669   : > { %3845 = vmatprep.subr.bf16.mxu1 %v4148_v3  ;;  %v2530_v1 = vsel %vm1385_vm4, %v2525_v59, 0 }
 0x66a   : > { %v4042_v5 = vpop.eup %4041  ;;  %v2325_v6 = vpack.c.bf16 %v2317_v11, %v2317_v11 }
 0x66b   : > { %v2318_v25 = vmul.f32 %v4042_v5, %v4718_v32 }
 0x66c   : > { %3830 = vmatmul.mubr.msk.bf16.vlgmr.msra.gmra.mrb[56].mxu0 %vm1283_vm5, %v2325_v6 }
 0x66d   : > { %3840 = vmatpush3.bf16.msra.mxu0 %v2482_v9  ;;  %v2326_v10 = vpack.c.bf16 %v2318_v25, %v2318_v25  ;;  %3841 = vmatprep.mubr.msk.bf16.mxu0 %vm4149_vm1, %v4148_v3 }
 0x66e   : > { %3851 = vmatprep.subr.bf16.mxu0 %v4148_v3 }
 0x66f   : > { %v4044_v12 = vpop.eup %4043  ;;  %3836 = vmatmul.mubr.msk.bf16.vlgmr.msra.gmra.mrb[48].mxu1 %vm1283_vm5, %v2326_v10 }
 0x670   : > { %v2319_v14 = vmul.f32 %v4044_v12, %v4722_v29  ;;  %3846 = vmatpush3.bf16.msra.mxu1 %v2530_v1  ;;  %3847 = vmatprep.mubr.msk.bf16.mxu1 %vm4149_vm1, %v4148_v3 }
 0x671   : > { %3857 = vmatprep.subr.bf16.mxu1 %v4148_v3 }
 0x672   : > { %v2327_v17 = vpack.c.bf16 %v2319_v14, %v2319_v14 }
 0x674   : > { %3842 = vmatmul.mubr.msk.bf16.vlgmr.msra.gmra.mrb[60].mxu0 %vm1283_vm5, %v2327_v17 }
 0x675   : > { %3852 = vmatpush3.bf16.msra.mxu0 %v2578_v18  ;;  %3853 = vmatprep.mubr.msk.bf16.mxu0 %vm4149_vm1, %v4148_v3 }
 0x676   : > { %3863 = vmatprep.subr.bf16.mxu0 %v4148_v3 }
 0x694   : > { %v2298_v8 = vpop.xlane.xlu1 %2297 }
 0x695   : > { %4045 = vrcp.f32 %v2298_v8 }
 0x698   : > { %v2304_v19 = vpop.xlane.xlu1 %2303 }
 0x699   : > { %4047 = vrcp.f32 %v2304_v19  ;;  %v2301_v20 = vpop.xlane.xlu0 %2300 }
 0x69a   : > { %4049 = vrcp.f32 %v2301_v20 }
 0x69c   : > { %v2669_v33 = vpop.permute.xlu1 %2668 }
 0x69d   : > { %v2307_v21 = vpop.xlane.xlu0 %2306  ;;  %v2674_v31 = vsel %vm1385_vm4, %v2669_v33, 0 }
 0x69e   : > { %4051 = vrcp.f32 %v2307_v21 }
 0x69f   : > { %v4046_v23 = vpop.eup %4045 }
 0x6a0   : > { %v2320_v24 = vmul.f32 %v4046_v23, %v4734_v44 }
 0x6a1   : > { %v2621_v27 = vpop.permute.xlu0 %2620 }
 0x6a2   : > { %v2328_v48 = vpack.c.bf16 %v2320_v24, %v2320_v24  ;;  %v2626_v41 = vsel %vm1385_vm4, %v2621_v27, 0 }
 0x6a3   : > { %v4048_v28 = vpop.eup %4047 }
 0x6a4   : > { %v4050_v42 = vpop.eup %4049  ;;  %3848 = vmatmul.mubr.msk.bf16.vlgmr.msra.gmra.mrb[52].mxu1 %vm1283_vm5, %v2328_v48  ;;  %v2322_v32 = vmul.f32 %v4048_v28, %v4738_v60  ;;  %v3547_v28 = vld [vmem:[%s740_s17] ss:$0 sm:$0xff] }
 0x6a5   : > { %v2321_v16 = vmul.f32 %v4050_v42, %v4740_v46  ;;  %3858 = vmatpush3.bf16.msra.mxu1 %v2626_v41  ;;  %v1768_v22 = vpop.permute.xlu0 %1767  ;;  %3859 = vmatprep.mubr.msk.bf16.mxu1 %vm4149_vm1, %v4148_v3 }
 0x6a6   : > { %1771 = vst.msk [vmem:[#allocation3] sm:$0xff] %vm1770_vm6, %v1768_v22  ;;  %3869 = vmatprep.subr.bf16.mxu1 %v4148_v3  ;;  %v2330_v35 = vpack.c.bf16 %v2322_v32, %v2322_v32 }
 0x6a7   : > { %v2329_v30 = vpack.c.bf16 %v2321_v16, %v2321_v16 }
 0x6a8   : > { %v4052_v29 = vpop.eup %4051 }
 0x6a9   : > { %3854 = vmatmul.mubr.msk.bf16.vlgmr.msra.gmra.mrb[64].mxu0 %vm1283_vm5, %v2329_v30  ;;  %v1774_v34 = vpop.permute.xlu0 %1773  ;;  %v2323_v36 = vmul.f32 %v4052_v29, %v4746_v62  ;;  %v4061_v30 = vld [vmem:[#allocation2] sm:$0xff] }
 0x6aa   : > { %3864 = vmatpush3.bf16.msra.mxu0 %v2674_v31  ;;  %1777 = vst.msk [vmem:[#allocation3] sm:$0xff] %vm1776_vm7, %v1774_v34  ;;  %3865 = vmatprep.mubr.msk.bf16.mxu0 %vm4149_vm1, %v4148_v3  ;;  %v4062_v34 = vld [vmem:[#allocation2 + $0x8] sm:$0xff] }
 0x6ab   : > { %3877 = vmatprep.subr.bf16.mxu0 %v4148_v3  ;;  %v2331_v38 = vpack.c.bf16 %v2323_v36, %v2323_v36 }
 0x6ac   : > { %3860 = vmatmul.mubr.msk.bf16.vlgmr.msra.gmra.mrb[56].mxu1 %vm1283_vm5, %v2330_v35 }
 0x6ad   : > { %v1780_v37 = vpop.permute.xlu0 %1779  ;;  %3873 = vmatprep.mubr.msk.bf16.mxu1 %vm4149_vm1, %v4148_v3  ;;  %3870 = vmatpush3.bf16.msra.mxu1 %v3977_v55 }
 0x6ae   : > { %1783 = vst.msk [vmem:[#allocation3] sm:$0xff] %vm1782_vm8, %v1780_v37  ;;  %3871 = vmatprep.subr.bf16.mxu1 %v4148_v3 }
 0x6b1   : > { %3866 = vmatmul.mubr.msk.bf16.vlgmr.msra.gmra.mrb[68].mxu0 %vm1283_vm5, %v2331_v38  ;;  %v1786_v39 = vpop.permute.xlu0 %1785  ;;  %3872 = vmatpush3.bf16.msra.mxu1 %v3978_v4 }
 0x6b2   : > { %1789 = vst.msk [vmem:[#allocation3] sm:$0xff] %vm1788_vm9, %v1786_v39  ;;  %3881 = vmatprep.mubr.msk.bf16.mxu0 %vm4149_vm1, %v4148_v3  ;;  %3885 = vmatprep.subr.bf16.mxu1 %v4148_v3 }
 0x6b5   : > { %v1792_v40 = vpop.permute.xlu0 %1791 }
 0x6b6   : > { %1795 = vst.msk [vmem:[#allocation3] sm:$0xff] %vm1794_vm10, %v1792_v40 }
 0x6b9   : > { %v1798_v45 = vpop.permute.xlu0 %1797 }
 0x6ba   : > { %1801 = vst.msk [vmem:[#allocation3] sm:$0xff] %vm1800_vm11, %v1798_v45 }
 0x6bd   : > { %v1804_v49 = vpop.permute.xlu0 %1803 }
 0x6be   : > { %1807 = vst.msk [vmem:[#allocation3] sm:$0xff] %vm1806_vm12, %v1804_v49 }
 0x6c5   : > { %v2752_v24 = vld [vmem:[#allocation3] sm:$0xff] }
 0x73a   : > { %v2374_v51 = vpop.f32.mrb[44].mxu1 }
 0x73b   : > { %2716 = vst.msk [vmem:[#allocation3 + $0x8] sm:$0xff] %vm893_vm3, %v2374_v51  ;;  %v3825_v53 = vpop.f32.mrb[45].mxu1 }
 0x73c   : > { %v2377_v54 = vpop.f32.mrb[46].mxu1 }
 0x73d   : > { %v3826_v52 = vpop.f32.mrb[47].mxu1 }
 0x73f   : > { %v2422_v44 = vpop.f32.mrb[56].mxu0 }
 0x740   : > { %2718 = vrot.lane.b32.xlu1 %v2422_v44, %s4159_s1  ;;  %v3831_v47 = vpop.f32.mrb[57].mxu0  ;;  %v3979_v44 = vld [vmem:[%s4323_s25] sm:$0xff]   ;;  %s5022_s1 = scalar_lea.vmem %s4985_s6, %s4285_s29 }
 0x741   : > { %v2425_v60 = vpop.f32.mrb[58].mxu0  ;;  %3878 = vmatpush3.bf16.msra.mxu0 %v3979_v44  ;;  %v3980_v47 = vld [vmem:[%s4323_s25 + $0x8] sm:$0xff]  }
 0x742   : > { %v3832_v46 = vpop.f32.mrb[59].mxu0  ;;  %v2470_v58 = vpop.f32.mrb[48].mxu1  ;;  %3879 = vmatprep.subr.bf16.mxu0 %v4148_v3  ;;  %v3981_v60 = vld [vmem:[%s4333_s18] sm:$0xff]  }
 0x743   : > { %v3837_v57 = vpop.f32.mrb[49].mxu1  ;;  %v3982_v46 = vld [vmem:[%s4333_s18 + $0x8] sm:$0xff]  }
 0x744   : > { %2723 = vrot.lane.b32.xlu1 %v2470_v58, %s4160_s4  ;;  %v2473_v62 = vpop.f32.mrb[50].mxu1  ;;  %v3983_v58 = vld [vmem:[%s4333_s18 + $0x10] sm:$0xff]   ;;  %v3984_v57 = vld [vmem:[%s4333_s18 + $0x18] sm:$0xff]  }
 0x745   : > { %v3838_v63 = vpop.f32.mrb[51].mxu1  ;;  %3880 = vmatpush3.bf16.msra.mxu0 %v3980_v47  ;;  %v3985_v62 = vld [vmem:[%s4333_s18 + $0x20] sm:$0xff]  }
 0x746   : > { %v3986_v63 = vld [vmem:[%s4333_s18 + $0x28] sm:$0xff]   ;;  %v3566_v47 = vld [vmem:[%s749_s20] ss:$0 sm:$0xff] }
 0x747   : > { %v2518_v13 = vpop.f32.mrb[60].mxu0 }
 0x748   : > { %2728 = vrot.lane.b32.xlu1 %v2518_v13, %s4161_s27  ;;  %v3843_v43 = vpop.f32.mrb[61].mxu0 }
 0x749   : > { %v2521_v50 = vpop.f32.mrb[62].mxu0 }
 0x74a   : > { %v3844_v56 = vpop.f32.mrb[63].mxu0 }
 0x777   : > { %v2566_v61 = vpop.f32.mrb[52].mxu1 }
 0x778   : > { %v3849_v0 = vpop.f32.mrb[53].mxu1  ;;  %2733 = vrot.lane.b32.xlu1 %v2566_v61, %s4162_s22 }
 0x779   : > { %v2569_v26 = vpop.f32.mrb[54].mxu1 }
 0x77a   : > { %v3850_v2 = vpop.f32.mrb[55].mxu1 }
 0x77b   : > { %v3551_v2 = vld [vmem:[%s5022_s1] ss:$0 sm:$0xff]  ;;  %s5025_s1 = sld [smem:[#allocation19_spill]] (!%p3568_p6) }
 0x77c   : > { %v2614_v7 = vpop.f32.mrb[64].mxu0 }
 0x77d   : > { %2738 = vrot.lane.b32.xlu1 %v2614_v7, %s4163_s28  ;;  %v3855_v11 = vpop.f32.mrb[65].mxu0  ;;  %s5023_s28 = scalar_lea.vmem %s4986_s7, %s4285_s29 }
 0x77e   : > { %v2617_v5 = vpop.f32.mrb[66].mxu0 }
 0x77f   : > { %v3856_v6 = vpop.f32.mrb[67].mxu0  ;;  %v2662_v25 = vpop.f32.mrb[56].mxu1  ;;  %v3552_v5 = vld [vmem:[%s5023_s28] ss:$0 sm:$0xff] }
 0x780   : > { %v3861_v9 = vpop.f32.mrb[57].mxu1 }
 0x781   : > { %2743 = vrot.lane.b32.xlu1 %v2662_v25, %s4164_s15  ;;  %v2665_v59 = vpop.f32.mrb[58].mxu1 }
 0x782   : > { %v3862_v10 = vpop.f32.mrb[59].mxu1 }
 0x783   : > { %v3987_v10 = vld [vmem:[%s4333_s18 + $0x30] sm:$0xff]  }
 0x784   : > { %v2710_v12 = vpop.f32.mrb[68].mxu0 }
 0x785   : > { %2748 = vrot.lane.b32.xlu1 %v2710_v12, %s4165_s21  ;;  %v3867_v1 = vpop.f32.mrb[69].mxu0  ;;  %v3988_v12 = vld [vmem:[%s4333_s18 + $0x38] sm:$0xff]  }
 0x786   : > { %v2713_v14 = vpop.f32.mrb[70].mxu0  ;;  %v3553_v1 = vld [vmem:[%s760_s26] ss:$0 sm:$0xff] }
 0x787   : > { %v3868_v15 = vpop.f32.mrb[71].mxu0 }
 0x7b2   : > { %v2719_v17 = vpop.permute.xlu1 %2718 }
 0x7b3   : > { %2721 = vst.msk [vmem:[#allocation3 + $0x8] sm:$0xff] %vm1770_vm6, %v2719_v17 }
 0x7b6   : > { %v2724_v18 = vpop.permute.xlu1 %2723 }
 0x7b7   : > { %2726 = vst.msk [vmem:[#allocation3 + $0x8] sm:$0xff] %vm1776_vm7, %v2724_v18 }
 0x7ba   : > { %v2729_v8 = vpop.permute.xlu1 %2728 }
 0x7bb   : > { %2731 = vst.msk [vmem:[#allocation3 + $0x8] sm:$0xff] %vm1782_vm8, %v2729_v8 }
 0x7ea   : > { %v2734_v19 = vpop.permute.xlu1 %2733 }
 0x7eb   : > { %2736 = vst.msk [vmem:[#allocation3 + $0x8] sm:$0xff] %vm1788_vm9, %v2734_v19 }
 0x7ef   : > { %v2739_v20 = vpop.permute.xlu1 %2738 }
 0x7f0   : > { %2741 = vst.msk [vmem:[#allocation3 + $0x8] sm:$0xff] %vm1794_vm10, %v2739_v20 }
 0x7f3   : > { %v2744_v21 = vpop.permute.xlu1 %2743 }
 0x7f4   : > { %2746 = vst.msk [vmem:[#allocation3 + $0x8] sm:$0xff] %vm1800_vm11, %v2744_v21 }
 0x7f7   : > { %v2749_v23 = vpop.permute.xlu1 %2748 }
 0x7f8   : > { %2751 = vst.msk [vmem:[#allocation3 + $0x8] sm:$0xff] %vm1806_vm12, %v2749_v23 }
 0x7ff   : > { %v2753_v27 = vld [vmem:[#allocation3 + $0x8] sm:$0xff] }
 0x800   : > { %v2754_v48 = vpack.c.bf16 %v2753_v27, %v2752_v24 }
 0x802   : > { %3874 = vmatmul.mubr.msk.bf16.vlgmr.msra.gmra.mrb[60].mxu1 %vm809_vm2, %v2754_v48 }
 0x803   : > { %3901 = vmatprep.mubr.msk.bf16.mxu1 %vm4149_vm1, %v4148_v3  ;;  %3886 = vmatpush3.bf16.msra.mxu1 %v3981_v60 }
 0x804   : > { %3887 = vmatprep.subr.bf16.mxu1 %v4148_v3 }
 0x807   : > { %3888 = vmatpush3.bf16.msra.mxu1 %v3982_v46 }
 0x808   : > { %3889 = vmatprep.subr.bf16.mxu1 %v4148_v3 }
 0x80b   : > { %3890 = vmatpush3.bf16.msra.mxu1 %v3983_v58  ;;  %v3567_v58 = vld [vmem:[%s752_s23] ss:$0 sm:$0xff]  ;;  %s5024_s23 = sld [smem:[#allocation18_spill]] (!%p3568_p6) }
 0x80c   : > { %3891 = vmatprep.subr.bf16.mxu1 %v4148_v3 }
 0x80f   : > { %3892 = vmatpush3.bf16.msra.mxu1 %v3984_v57 }
 0x810   : > { %3893 = vmatprep.subr.bf16.mxu1 %v4148_v3 }
 0x813   : > { %3894 = vmatpush3.bf16.msra.mxu1 %v3985_v62 }
 0x814   : > { %3895 = vmatprep.subr.bf16.mxu1 %v4148_v3 }
 0x817   : > { %3896 = vmatpush3.bf16.msra.mxu1 %v3986_v63 }
 0x818   : > { %3897 = vmatprep.subr.bf16.mxu1 %v4148_v3 }
 0x81b   : > { %3898 = vmatpush3.bf16.msra.mxu1 %v3987_v10 }
 0x81c   : > { %3899 = vmatprep.subr.bf16.mxu1 %v4148_v3  ;;  %v3557_v3 = vld [vmem:[%s768_s2] ss:$0 sm:$0xff] }
 0x81f   : > { %3900 = vmatpush3.bf16.msra.mxu1 %v3988_v12 }
 0x8d5   : > { %v2815_v42 = vpop.f32.mrb[60].mxu1 }
 0x8d6   : > { %v2816_v41 = vadd.f32 %v3547_v28, %v2815_v42  ;;  %v3875_v16 = vpop.f32.mrb[61].mxu1 }
 0x8d7   : > { %v2818_v22 = vpop.f32.mrb[62].mxu1 }
 0x8d8   : > { %v2819_v32 = vadd.f32 %v3547_v28, %v2818_v22  ;;  %v3876_v33 = vpop.f32.mrb[63].mxu1  ;;  %v2822_v29 = vadd.f32 %v4061_v30, %v2816_v41 }
 0x8da   : > { %v2826_v31 = vsel %vm809_vm2, %v2822_v29, 0.0  ;;  %v2823_v35 = vadd.f32 %v4062_v34, %v2819_v32 }
 0x8db   : > { %2827 = vadd.xlane.f32.xlu0 %v2826_v31 }
 0x8dc   : > { %v2829_v36 = vsel %vm809_vm2, %v2823_v35, 0.0 }
 0x8dd   : > { %2830 = vadd.xlane.f32.xlu1 %v2829_v36 }
 0x968   : > { %v2828_v37 = vpop.xlane.xlu0 %2827 }
 0x969   : > { %v2833_v38 = vmul.f32 0.03125, %v2828_v37 }
 0x96a   : > { %v2831_v39 = vpop.xlane.xlu1 %2830 }
 0x96b   : > { %v2835_v40 = vsub.f32 %v2822_v29, %v2833_v38  ;;  %v2834_v45 = vmul.f32 0.03125, %v2831_v39 }
 0x96d   : > { %v2836_v49 = vsub.f32 %v2823_v35, %v2834_v45  ;;  %v2837_v51 = vmul.f32 %v2835_v40, %v2835_v40 }
 0x96f   : > { %v2839_v53 = vsel %vm809_vm2, %v2837_v51, 0.0  ;;  %v2838_v54 = vmul.f32 %v2836_v49, %v2836_v49 }
 0x970   : > { %2840 = vadd.xlane.f32.xlu0 %v2839_v53 }
 0x971   : > { %v2842_v52 = vsel %vm809_vm2, %v2838_v54, 0.0 }
 0x974   : > { %2843 = vadd.xlane.f32.xlu0 %v2842_v52 }
 0x9fd   : > { %v2841_v13 = vpop.xlane.xlu0 %2840 }
 0x9fe   : > { %v2845_v43 = vmul.f32 0.03125, %v2841_v13 }
 0xa00   : > { %v2847_v50 = vadd.f32 1e-05, %v2845_v43 }
 0xa01   : > { %v2844_v56 = vpop.xlane.xlu0 %2843 }
 0xa02   : > { %4053 = vrsqrt.f32 %v2847_v50  ;;  %v2846_v61 = vmul.f32 0.03125, %v2844_v56  ;;  %v4166_v50 = vmov (!%p3568_p6), 0.0   ;;  %v3104_v56 = vld [vmem:[%s5024_s23] sm:$0x3] (!%p3568_p6) }
 0xa03   : > { %3905 = vmatprep.subr.mxu0 (!%p3568_p6), %v4166_v50  ;;  %3910 = vmatprep.subr.mxu1 (!%p3568_p6), %v4166_v50 }
 0xa04   : > { %v2848_v0 = vadd.f32 1e-05, %v2846_v61  ;;  %v3105_v61 = vld [vmem:[%s5025_s1] sm:$0x3] (!%p3568_p6) }
 0xa06   : > { %4055 = vrsqrt.f32 %v2848_v0  ;;  %v4168_v0 = vmov (!%p3568_p6), 0  }
 0xa07   : > { %4063 = vset.pattern.permute.xlu0 (!%p3568_p6), %v4168_v0 }
 0xa0c   : > { %v4054_v55 = vpop.eup %4053 }
 0xa0d   : > { %v2851_v26 = vmul.f32 %v4054_v55, %v2835_v40 }
 0xa0f   : > { %v2859_v7 = vmul.f32 %v3551_v2, %v2851_v26 }
 0xa10   : > { %v4056_v4 = vpop.eup %4055 }
 0xa11   : > { %v2852_v11 = vmul.f32 %v4056_v4, %v2836_v49  ;;  %v2867_v25 = vadd.f32 %v3552_v5, %v2859_v7 }
 0xa13   : > { %v2860_v6 = vmul.f32 %v3551_v2, %v2852_v11 }
 0xa15   : > { %v2868_v9 = vadd.f32 %v3552_v5, %v2860_v6 }
 0xa17   : > { %v2869_v59 = vpack.c.bf16 %v2868_v9, %v2867_v25 }
 0xa19   : > { %3882 = vmatmul.mubr.msk.bf16.vlgmr.msra.gmra.mrb[72].mxu0 %vm809_vm2, %v2869_v59 }
 0xa1a   : > { %3907 = vmatprep.mubr.msk.f32.mxu0 (!%p3568_p6), %vm4167_vm13, %v4166_v50 }
 0xaec   : > { %v2930_v14 = vpop.f32.mrb[72].mxu0 }
 0xaed   : > { %v2931_v15 = vadd.f32 %v3553_v1, %v2930_v14  ;;  %v3883_v17 = vpop.f32.mrb[73].mxu0 }
 0xaee   : > { %v2933_v18 = vpop.f32.mrb[74].mxu0 }
 0xaef   : > { %v2934_v8 = vadd.f32 %v3553_v1, %v2933_v18  ;;  %v3884_v19 = vpop.f32.mrb[75].mxu0  ;;  %v2937_v20 = vmax.f32 %v2931_v15, 0.0 }
 0xaf1   : > { %v2938_v21 = vmax.f32 %v2934_v8, 0.0 }
 0xaf3   : > { %v2939_v23 = vpack.c.bf16 %v2938_v21, %v2937_v20 }
 0xaf5   : > { %3902 = vmatmul.mubr.bf16.vlgmr.msra.gmra.mrb[64].mxu1 %v2939_v23 }
 0xaf6   : > { %3912 = vmatprep.mubr.msk.f32.mxu1 (!%p3568_p6), %vm4167_vm13, %v4166_v50 }
 0xbc8   : > { %v3045_v24 = vpop.f32.mrb[64].mxu1 }
 0xbc9   : > { %v3046_v27 = vadd.f32 %v3557_v3, %v3045_v24  ;;  %v3903_v48 = vpop.f32.mrb[65].mxu1 }
 0xbca   : > { %v3048_v28 = vpop.f32.mrb[66].mxu1 }
 0xbcb   : > { %v3049_v42 = vadd.f32 %v3557_v3, %v3048_v28  ;;  %v3904_v41 = vpop.f32.mrb[67].mxu1  ;;  %v3052_v16 = vadd.f32 %v3046_v27, %v2867_v25 }
 0xbcd   : > { %v3053_v22 = vadd.f32 %v3049_v42, %v2868_v9  ;;  %v3056_v32 = vsel %vm809_vm2, %v3052_v16, 0.0 }
 0xbce   : > { %3057 = vadd.xlane.f32.xlu1 %v3056_v32 }
 0xbcf   : > { %v3059_v33 = vsel %vm809_vm2, %v3053_v22, 0.0 }
 0xbd0   : > { %3060 = vadd.xlane.f32.xlu0 %v3059_v33 }
 0xc5b   : > { %v3058_v30 = vpop.xlane.xlu1 %3057 }
 0xc5c   : > { %v3062_v29 = vmul.f32 0.03125, %v3058_v30 }
 0xc5d   : > { %v3061_v31 = vpop.xlane.xlu0 %3060 }
 0xc5e   : > { %v3064_v34 = vsub.f32 %v3052_v16, %v3062_v29  ;;  %v3063_v35 = vmul.f32 0.03125, %v3061_v31 }
 0xc60   : > { %v3065_v36 = vsub.f32 %v3053_v22, %v3063_v35  ;;  %v3066_v37 = vmul.f32 %v3064_v34, %v3064_v34 }
 0xc62   : > { %v3068_v38 = vsel %vm809_vm2, %v3066_v37, 0.0  ;;  %v3067_v39 = vmul.f32 %v3065_v36, %v3065_v36 }
 0xc63   : > { %3069 = vadd.xlane.f32.xlu1 %v3068_v38 }
 0xc64   : > { %v3071_v40 = vsel %vm809_vm2, %v3067_v39, 0.0 }
 0xc65   : > { %3072 = vadd.xlane.f32.xlu0 %v3071_v40 }
 0xc7b   : > { %3108 = vperm.xlu0 (!%p3568_p6), %4063, %v3105_v61  }
 0xcf0   : > { %v3070_v45 = vpop.xlane.xlu1 %3069 }
 0xcf1   : > { %v3074_v49 = vmul.f32 0.03125, %v3070_v45 }
 0xcf2   : > { %v3073_v51 = vpop.xlane.xlu0 %3072 }
 0xcf3   : > { %v3076_v53 = vadd.f32 1e-05, %v3074_v49  ;;  %v3075_v54 = vmul.f32 0.03125, %v3073_v51 }
 0xcf5   : > { %4057 = vrsqrt.f32 %v3076_v53  ;;  %v3077_v52 = vadd.f32 1e-05, %v3075_v54 }
 0xcf7   : > { %4059 = vrsqrt.f32 %v3077_v52 }
 0xcfa   : > { %v3109_v55 = vpop.permute.xlu0 (!%p3568_p6), %3108 }
 0xcff   : > { %v4058_v44 = vpop.eup %4057 }
 0xd00   : > { %v3080_v60 = vmul.f32 %v4058_v44, %v3064_v34 }
 0xd01   : > { %v4060_v46 = vpop.eup %4059 }
 0xd02   : > { %v3088_v57 = vmul.f32 %v3566_v47, %v3080_v60  ;;  %v3081_v62 = vmul.f32 %v4060_v46, %v3065_v36  ;;  %3103 = sbr.rel (%p3568_p6) target bundleno = 3555 (0xde3), region = 92 }
 0xd04   : > { %v3096_v63 = vadd.f32 %v3567_v58, %v3088_v57  ;;  %v3089_v13 = vmul.f32 %v3566_v47, %v3081_v62 }
 0xd06   : > { %3098 = vst.msk [vmem:[#allocation2] sm:$0xff] %vm809_vm2, %v3096_v63  ;;  %v3097_v43 = vadd.f32 %v3567_v58, %v3089_v13  ;;  %3906 = vmatpush3.xpose.msk.msra.mxu0 (!%p3568_p6), %vm809_vm2, %v3096_v63 }
 0xd08   : > { %3099 = vst.msk [vmem:[#allocation2 + $0x8] sm:$0xff] %vm809_vm2, %v3097_v43  ;;  %3911 = vmatpush3.xpose.msk.msra.mxu1 (!%p3568_p6), %vm809_vm2, %v3097_v43 }
 0xd09   : > { %3908 = vmatmul.mubr.msk.f32.vlgmr.msra.gmra.mrb[0].mxu0 %vm809_vm2, %v3104_v56 }
 0xd0b   : > { %3913 = vmatmul.mubr.msk.f32.vlgmr.msra.gmra.mrb[0].mxu1 %vm809_vm2, %v3104_v56 }
 0xddc   : > { %v3183_v26 = vpop.f32.mrb[0].mxu0 }
 0xddd   : > { %v3184_v4 = vadd.f32 %v3183_v26, %v3109_v55  ;;  %v3909_v11 = vpop.f32.mrb[1].mxu0 }
 0xdde   : > { %v3260_v2 = vpop.f32.mrb[0].mxu1 }
 0xddf   : > { %v3261_v7 = vadd.f32 %v3260_v2, %v3109_v55  ;;  %v3914_v5 = vpop.f32.mrb[1].mxu1  ;;  %3188 = vst.msk [vmem:[#allocation4] sm:$0x1] %vm3187_vm14, %v3184_v4 }
 0xde0   : > { %3190 = vst.msk [vmem:[#allocation6 - $0x1] sm:$0x2] %vm3189_vm15, %v3184_v4 }
 0xde1   : > { %3265 = vst.msk [vmem:[#allocation4 + $0x1] sm:$0x1] %vm3187_vm14, %v3261_v7 }
 0xde2   : > { %3267 = vst.msk [vmem:[#allocation6] sm:$0x2] %vm3189_vm15, %v3261_v7 }
 0xde3 PF: > { %s5026_s24 = sld [smem:[#allocation11_spill]]  ;;  %s4169_s28 = smov [#allocation4]  }
 0xde4   : > { %s3277_s15 = sshll.u32 %s4169_s28, 4  ;;  %s4170_s21 = smov [#allocation6]   ;;  %s3278_s15 = int_to_ptr.vmem [resolvable:$true] %s3277_s15 }
 0xde5   : > { %s3293_s16 = sshll.u32 %s4170_s21, 4  ;;  %s4064_s30 = scalar_lea.vmem %s3278_s15, 32  ;;  %s3294_s16 = int_to_ptr.vmem [resolvable:$true] %s3293_s16 }
 0xde6   : > { %p4065_p8 = scmp.ne.s32.totalorder %s3278_s15, %s4064_s30  ;;  %p4071_p11 = scmp.lt.s32.totalorder %s3278_s15, %s3278_s15 }
 0xde7   : > { %p4072_p12 = scmp.lt.s32.totalorder %s4064_s30, %s4064_s30 }
 0xde9   : > { %s5027_s4 = sadd.s32 4294967295, %s5026_s24   ;;  %p4073_p13 = por %p4072_p12, %p4071_p11 }
 0xdea   : > { %p4918_p7 = scmp.eq.s32.totalorder %s5027_s4, 1 }
 0xdec   : > { %p4066_p9 = pnand %p4065_p8, %p4918_p7 }
 0xdee   : > { %p4067_p10 = pneg %p4066_p9 }
 0xdf0   : > { %p4074_p0 = pnand %p4073_p13, %p4067_p10 }
 0xdf2   : > { %4077 = shalt.err (!%p4074_p0)
}
 0xdf3   : > { %s5029_s2 = sld [smem:[#allocation20_spill]] }
 0xdf9   : > { %s4078_s19 = scalar_lea.hbm %s5029_s2, 32 }
 0xdfa   : > { %p4079_p1 = scmp.ne.s32.totalorder %s5029_s2, %s4078_s19  ;;  %p4084_p4 = scmp.lt.u32.totalorder %s4078_s19, %s5029_s2 }
 0xdfc   : > { %p4080_p2 = pnand %p4079_p1, %p4918_p7 }
 0xdfe   : > { %p4081_p3 = pneg %p4080_p2 }
 0xe00   : > { %p4086_p5 = pnand %p4084_p4, %p4081_p3 }
 0xe02   : > { %4089 = shalt.err (!%p4086_p5)
}
 0xe03   : > { %s4171_s25 = smov 1   ;;  %s4090_s4 = scalar_lea.vmem %s3294_s16, 32 }
 0xe04   : > { %3916 = dma.vmem_to_hbm [thread:$0]  (%p4918_p7), %s3278_s15, 32, %s5029_s2, [#allocation5], %s4162_s22, %s4162_s22, %s4171_s25  }
 0xe05   : > { %p4091_p6 = scmp.ne.s32.totalorder %s3294_s16, %s4090_s4  ;;  %p4097_p10 = scmp.lt.s32.totalorder %s3294_s16, %s3294_s16 }
 0xe06   : > { %p4098_p11 = scmp.lt.s32.totalorder %s4090_s4, %s4090_s4 }
 0xe07   : > { %p4092_p8 = pnand %p4091_p6, %p4918_p7 }
 0xe08   : > { %p4099_p12 = por %p4098_p11, %p4097_p10 }
 0xe09   : > { %p4093_p9 = pneg %p4092_p8 }
 0xe0b   : > { %p4100_p13 = pnand %p4099_p12, %p4093_p9 }
 0xe0d   : > { %4103 = shalt.err (!%p4100_p13)
}
 0xe0e   : > { %s5030_s30 = sld [smem:[#allocation21_spill]] }
 0xe14   : > { %s4104_s18 = scalar_lea.hbm %s5030_s30, 32 }
 0xe15   : > { %p4105_p0 = scmp.ne.s32.totalorder %s5030_s30, %s4104_s18  ;;  %p4110_p3 = scmp.lt.u32.totalorder %s4104_s18, %s5030_s30 }
 0xe17   : > { %p4106_p1 = pnand %p4105_p0, %p4918_p7 }
 0xe19   : > { %p4107_p2 = pneg %p4106_p1 }
 0xe1b   : > { %p4112_p4 = pnand %p4110_p3, %p4107_p2 }
 0xe1d   : > { %4115 = shalt.err (!%p4112_p4)
}
 0xe1e   : > { %3918 = dma.vmem_to_hbm [thread:$0]  (%p4918_p7), %s3294_s16, 32, %s5030_s30, [#allocation7], %s4162_s22, %s4162_s22, %s4171_s25  }
 0xe1f   : > { %4129 = dma.done.wait (%p4918_p7), [#allocation5], 32  }
 0xe20   : > { %4131 = vsyncadd (%p4918_p7), [#allocation5], 4294967264 }
 0xe21   : > { %4133 = dma.done.wait (%p4918_p7), [#allocation7], 32  }
 0xe22   : > { %4135 = vsyncadd (%p4918_p7), [#allocation7], 4294967264 }
 0xe23 PF: > { %s5031_s17 = sld [smem:[#allocation11_spill]]  ;;  %s5032_s24 = sld [smem:[#allocation10_spill]] }
 0xe24   : > { %s5033_s25 = sld [smem:[#allocation12_spill]] }
 0xe29   : > { %s30_s26 = sadd.s32 1, %s5031_s17  }
 0xe2a   : > { %p27_p5 = scmp.ge.s32.totalorder %s30_s26, 4  }
 0xe2c   :  { %29 = sbr.rel (!%p27_p5) target bundleno = 12 (0xc), region = 170 }
 0xe33   :  { %3313 = vsyncpa [#allocation5], 1 }
 0xe34   :  { %3315 = vsyncpa [#allocation5 + $0x1], 1 }
 0xe35   :  { %3316 = vsyncpa [#allocation7], 1 }

</bundles_post_ra>
